<compile_context>
chip_gen: v7x
topology: tpu7x:2x2x1
jax: 0.10.0
libtpu: 0.0.40
codegen_flags: <defaults>
</compile_context>

<pallas_src>
from functools import partial

import jax
import jax.numpy as jnp
from jax.experimental import pallas as pl
from jax.experimental.pallas import tpu as pltpu


def attention_v2_kernel(x_ref, wqkv_ref, wp_ref, bp_ref, o_ref,
                        qkv_ref, ctx_ref, *, num_heads, block_q):
    """Grid point = (batch element, query tile).

    x (and the derived q/k/v scratch) stay resident across a batch element's
    query tiles; each step only materializes a (block_q, N) score tile per head.
    """
    qi = pl.program_id(1)
    C = x_ref.shape[-1]
    hd = C // num_heads

    # Fused Q|K|V projection, once per batch element (first query tile), into a
    # persistent VMEM scratch.  The attention scale is pre-folded into the Wq
    # columns by the wrapper, so no score scaling is needed below.
    @pl.when(qi == 0)
    def _():
        qkv = jnp.dot(x_ref[0], wqkv_ref[...],
                      preferred_element_type=jnp.float32)            # (N, 3C)
        qkv_ref[...] = qkv.astype(qkv_ref.dtype)

    q_start = pl.multiple_of(qi * block_q, block_q)

    for h in range(num_heads):                    # small static head loop
        c0 = h * hd
        qh = qkv_ref[pl.ds(q_start, block_q), c0:c0 + hd]             # (TQ, hd)
        kh = qkv_ref[:, C + c0:C + c0 + hd]                           # (N, hd)
        vh = qkv_ref[:, 2 * C + c0:2 * C + c0 + hd]                   # (N, hd)

        # scores = q @ k.T (contract head_dim); scale already folded into q.
        s = jax.lax.dot_general(qh, kh, (((1,), (1,)), ((), ())),
                                preferred_element_type=jnp.float32)   # (TQ, N)
        s = s - jnp.max(s, axis=-1, keepdims=True)
        p = jnp.exp(s)
        l = jnp.sum(p, axis=-1, keepdims=True)                        # (TQ, 1)

        # Unnormalized context, then deferred normalization on (TQ, hd) only.
        ctx_h = jnp.dot(p.astype(vh.dtype), vh,
                        preferred_element_type=jnp.float32)           # (TQ, hd)
        ctx_ref[:, c0:c0 + hd] = ctx_h * pl.reciprocal(l)

    # Output projection (with bias) from the head-assembled context scratch.
    out = jnp.dot(ctx_ref[...].astype(wp_ref.dtype), wp_ref[...],
                  preferred_element_type=jnp.float32) + bp_ref[...]   # (TQ, C)
    o_ref[0] = out.astype(o_ref.dtype)


def _pick_block_q(n, tq_max):
    """Largest multiple-of-8 divisor of n that is <= tq_max (else n itself)."""
    if n <= tq_max:
        return n
    best = None
    for d in range(8, tq_max + 1, 8):
        if n % d == 0:
            best = d
    return best if best is not None else n


def attention_v2(x, H, W, params, *, num_heads=8, block_q=128):
    """x: (B, N, C) with N == H*W. params: dict of pre-transposed weights."""
    B, N, C = x.shape
    assert N == H * W and C % num_heads == 0
    hd = C // num_heads
    scale = hd ** -0.5

    # Fuse q/k/v weights into a single (C, 3C) operand; fold the attention
    # scale into the q columns so the kernel never scales the score matrix.
    wqkv = jnp.concatenate(
        [params["wq"] * scale, params["wk"], params["wv"]], axis=1)

    tq = _pick_block_q(N, block_q)
    assert N % tq == 0
    grid = (B, N // tq)

    kernel = partial(attention_v2_kernel, num_heads=num_heads, block_q=tq)
    return pl.pallas_call(
        kernel,
        out_shape=jax.ShapeDtypeStruct((B, N, C), x.dtype),
        grid_spec=pltpu.PrefetchScalarGridSpec(
            num_scalar_prefetch=0,
            grid=grid,
            in_specs=[
                pl.BlockSpec((1, N, C), lambda b, qi: (b, 0, 0)),   # x (resident per b)
                pl.BlockSpec((C, 3 * C), lambda b, qi: (0, 0)),     # Wq|Wk|Wv fused
                pl.BlockSpec((C, C), lambda b, qi: (0, 0)),         # Wproj (in, out)
                pl.BlockSpec((1, C), lambda b, qi: (0, 0)),         # bproj
            ],
            out_specs=pl.BlockSpec((1, tq, C), lambda b, qi: (b, qi, 0)),
            scratch_shapes=[
                pltpu.VMEM((N, 3 * C), x.dtype),    # resident q|k|v per batch elem
                pltpu.VMEM((tq, C), jnp.float32),   # per-tile head-concat context
            ],
        ),
        compiler_params=pltpu.CompilerParams(
            # Batch axis is independent (megacore-shardable on v7x); the
            # query-tile axis reuses the qkv scratch computed at qi == 0, so it
            # must remain a serial ("arbitrary") axis.
            dimension_semantics=("parallel", "arbitrary")),
    )(x, wqkv, params["wp"], params["bp"])


def attention_v2_reference(x, params, *, num_heads=8):
    """Plain-JAX reference mirroring the PyTorch forward (default config)."""
    B, N, C = x.shape
    hd = C // num_heads
    scale = hd ** -0.5
    q = x @ params["wq"]
    k = x @ params["wk"]
    v = x @ params["wv"]
    q = q.reshape(B, N, num_heads, hd).transpose(0, 2, 1, 3)
    k = k.reshape(B, N, num_heads, hd).transpose(0, 2, 1, 3)
    v = v.reshape(B, N, num_heads, hd).transpose(0, 2, 1, 3)
    attn = (q @ jnp.swapaxes(k, -2, -1)) * scale
    attn = jax.nn.softmax(attn, axis=-1)
    out = (attn @ v).transpose(0, 2, 1, 3).reshape(B, N, C)
    return out @ params["wp"] + params["bp"]


def init_params(key, dim):
    """Synthetic init matching the module's _init_weights for Linear weights
    (trunc_normal std=0.02).  Weights are stored pre-transposed as
    (in_features, out_features).  The module inits the proj bias to 0; a small
    nonzero bias is used here so the bias-add path is actually exercised."""
    ks = jax.random.split(key, 5)

    def trunc(k):
        return (jax.random.truncated_normal(k, -2.0, 2.0, (dim, dim), jnp.float32)
                * 0.02)

    return {
        "wq": trunc(ks[0]),                 # q: Linear(dim, dim, bias=False)
        "wk": trunc(ks[1]),                 # k: Linear(dim, dim, bias=False)
        "wv": trunc(ks[2]),                 # v: Linear(dim, dim, bias=False)
        "wp": trunc(ks[3]),                 # proj: Linear(dim, dim)
        "bp": jax.random.normal(ks[4], (1, dim), jnp.float32) * 0.02,
    }


if __name__ == "__main__":
    key = jax.random.PRNGKey(0)
    k_x, k_p = jax.random.split(key)

    B, H, W, dim, num_heads = 2, 8, 8, 32, 8
    N = H * W
    x = jax.random.normal(k_x, (B, N, dim), jnp.float32)
    params = init_params(k_p, dim)

    # block_q=16 -> 4 query tiles per batch element, exercising the tiled path.
    out = attention_v2(x, H, W, params, num_heads=num_heads, block_q=16)
    out = jax.block_until_ready(out)

    ref = attention_v2_reference(x, params, num_heads=num_heads)
    assert out.shape == (B, N, dim)
    assert jnp.allclose(out, ref, atol=1e-5, rtol=1e-5), "mismatch vs reference"

    print("KERNEL_OK")
</pallas_src>

<mosaic_0001>
module attributes {stable_mosaic.version = 11 : i64} {
  func.func @attention_v2_kernel(%arg0: i32, %arg1: i32, %arg2: memref<1x64x32xf32, #tpu.memory_space<vmem>>, %arg3: memref<32x96xf32, #tpu.memory_space<vmem>>, %arg4: memref<32x32xf32, #tpu.memory_space<vmem>>, %arg5: memref<1x32xf32, #tpu.memory_space<vmem>>, %arg6: memref<1x16x32xf32, #tpu.memory_space<vmem>>, %arg7: memref<64x96xf32, #tpu.memory_space<vmem>>, %arg8: memref<16x32xf32, #tpu.memory_space<vmem>>) attributes {dimension_semantics = [#tpu.dimension_semantics<parallel>, #tpu.dimension_semantics<arbitrary>], iteration_bounds = array<i64: 2, 4>, scalar_prefetch = 0 : i64, scratch_operands = 2 : i64, tpu.core_type = #tpu.core_type<tc>, window_params = [{transform_indices = @transform_0, window_bounds = array<i64: 1, 64, 32>}, {pipeline_mode = #tpu.pipeline_mode<synchronous>, transform_indices = @transform_1, window_bounds = array<i64: 32, 96>}, {pipeline_mode = #tpu.pipeline_mode<synchronous>, transform_indices = @transform_2, window_bounds = array<i64: 32, 32>}, {pipeline_mode = #tpu.pipeline_mode<synchronous>, transform_indices = @transform_3, window_bounds = array<i64: 1, 32>}, {transform_indices = @transform_4, window_bounds = array<i64: 1, 16, 32>}]} {
    %c0_i32 = arith.constant 0 : i32
    %0 = arith.cmpi eq, %arg1, %c0_i32 : i32
    %1 = arith.extui %0 : i1 to i32
    %c0_i32_0 = arith.constant 0 : i32
    %2 = arith.cmpi ne, %1, %c0_i32_0 : i32
    scf.if %2 {
      %c0_74 = arith.constant 0 : index
      %c0_75 = arith.constant 0 : index
      %c0_76 = arith.constant 0 : index
      %150 = vector.load %arg2[%c0_74, %c0_75, %c0_76] : memref<1x64x32xf32, #tpu.memory_space<vmem>>, vector<1x64x32xf32>
      %151 = vector.shape_cast %150 : vector<1x64x32xf32> to vector<64x32xf32>
      %c0_77 = arith.constant 0 : index
      %c0_78 = arith.constant 0 : index
      %152 = vector.load %arg3[%c0_77, %c0_78] : memref<32x96xf32, #tpu.memory_space<vmem>>, vector<32x96xf32>
      %cst_79 = arith.constant dense<0.000000e+00> : vector<64x96xf32>
      %153 = tpu.matmul %151, %152, %cst_79 {dimension_numbers = #tpu.dot_dimension_numbers<[1], [0], [0], [1], [0, 0, 1, 1], [], []>} : vector<64x32xf32>, vector<32x96xf32>, vector<64x96xf32> -> vector<64x96xf32>
      %c0_80 = arith.constant 0 : index
      %c0_81 = arith.constant 0 : index
      %154 = vector.load %arg7[%c0_80, %c0_81] : memref<64x96xf32, #tpu.memory_space<vmem>>, vector<64x96xf32>
      tpu.vector_store %arg7[%c0_80, %c0_81], %153 {strides = array<i32>} : memref<64x96xf32, #tpu.memory_space<vmem>>, vector<64x96xf32>,
    } else {
    }
    %c16_i32 = arith.constant 16 : i32
    %3 = arith.muli %arg1, %c16_i32 : i32
    %4 = tpu.assume_multiple %3, 16 : i32
    %5 = arith.index_cast %4 : i32 to index
    %c0 = arith.constant 0 : index
    %6 = vector.load %arg7[%5, %c0] : memref<64x96xf32, #tpu.memory_space<vmem>>, vector<16x4xf32>
    %c0_1 = arith.constant 0 : index
    %c32 = arith.constant 32 : index
    %7 = vector.load %arg7[%c0_1, %c32] : memref<64x96xf32, #tpu.memory_space<vmem>>, vector<64x4xf32>
    %c0_2 = arith.constant 0 : index
    %c64 = arith.constant 64 : index
    %8 = vector.load %arg7[%c0_2, %c64] : memref<64x96xf32, #tpu.memory_space<vmem>>, vector<64x4xf32>
    %cst = arith.constant dense<0.000000e+00> : vector<16x64xf32>
    %9 = tpu.matmul %6, %7, %cst {dimension_numbers = #tpu.dot_dimension_numbers<[1], [1], [0], [0], [0, 0, 1, 0], [], []>} : vector<16x4xf32>, vector<64x4xf32>, vector<16x64xf32> -> vector<16x64xf32>
    %cst_3 = arith.constant dense<0xFF800000> : vector<16xf32>
    %10 = vector.multi_reduction <maximumf>, %9, %cst_3 [1] : vector<16x64xf32> to vector<16xf32>
    %11 = vector.shape_cast %10 : vector<16xf32> to vector<16x1xf32>
    %12 = vector.broadcast %11 : vector<16x1xf32> to vector<16x64xf32>
    %13 = arith.subf %9, %12 : vector<16x64xf32>
    %14 = math.exp %13 : vector<16x64xf32>
    %cst_4 = arith.constant dense<0.000000e+00> : vector<16xf32>
    %15 = vector.multi_reduction <add>, %14, %cst_4 [1] : vector<16x64xf32> to vector<16xf32>
    %16 = vector.shape_cast %15 : vector<16xf32> to vector<16x1xf32>
    %cst_5 = arith.constant dense<0.000000e+00> : vector<16x4xf32>
    %17 = tpu.matmul %14, %8, %cst_5 {dimension_numbers = #tpu.dot_dimension_numbers<[1], [0], [0], [1], [0, 0, 1, 1], [], []>} : vector<16x64xf32>, vector<64x4xf32>, vector<16x4xf32> -> vector<16x4xf32>
    %18 = tpu.reciprocal %16 : vector<16x1xf32> -> vector<16x1xf32>
    %19 = vector.broadcast %18 : vector<16x1xf32> to vector<16x4xf32>
    %20 = arith.mulf %17, %19 : vector<16x4xf32>
    %c0_6 = arith.constant 0 : index
    %c0_7 = arith.constant 0 : index
    %21 = vector.load %arg8[%c0_6, %c0_7] : memref<16x32xf32, #tpu.memory_space<vmem>>, vector<16x4xf32>
    tpu.vector_store %arg8[%c0_6, %c0_7], %20 {strides = array<i32>} : memref<16x32xf32, #tpu.memory_space<vmem>>, vector<16x4xf32>,
    %22 = arith.index_cast %4 : i32 to index
    %c4 = arith.constant 4 : index
    %23 = vector.load %arg7[%22, %c4] : memref<64x96xf32, #tpu.memory_space<vmem>>, vector<16x4xf32>
    %c0_8 = arith.constant 0 : index
    %c36 = arith.constant 36 : index
    %24 = vector.load %arg7[%c0_8, %c36] : memref<64x96xf32, #tpu.memory_space<vmem>>, vector<64x4xf32>
    %c0_9 = arith.constant 0 : index
    %c68 = arith.constant 68 : index
    %25 = vector.load %arg7[%c0_9, %c68] : memref<64x96xf32, #tpu.memory_space<vmem>>, vector<64x4xf32>
    %cst_10 = arith.constant dense<0.000000e+00> : vector<16x64xf32>
    %26 = tpu.matmul %23, %24, %cst_10 {dimension_numbers = #tpu.dot_dimension_numbers<[1], [1], [0], [0], [0, 0, 1, 0], [], []>} : vector<16x4xf32>, vector<64x4xf32>, vector<16x64xf32> -> vector<16x64xf32>
    %cst_11 = arith.constant dense<0xFF800000> : vector<16xf32>
    %27 = vector.multi_reduction <maximumf>, %26, %cst_11 [1] : vector<16x64xf32> to vector<16xf32>
    %28 = vector.shape_cast %27 : vector<16xf32> to vector<16x1xf32>
    %29 = vector.broadcast %28 : vector<16x1xf32> to vector<16x64xf32>
    %30 = arith.subf %26, %29 : vector<16x64xf32>
    %31 = math.exp %30 : vector<16x64xf32>
    %cst_12 = arith.constant dense<0.000000e+00> : vector<16xf32>
    %32 = vector.multi_reduction <add>, %31, %cst_12 [1] : vector<16x64xf32> to vector<16xf32>
    %33 = vector.shape_cast %32 : vector<16xf32> to vector<16x1xf32>
    %cst_13 = arith.constant dense<0.000000e+00> : vector<16x4xf32>
    %34 = tpu.matmul %31, %25, %cst_13 {dimension_numbers = #tpu.dot_dimension_numbers<[1], [0], [0], [1], [0, 0, 1, 1], [], []>} : vector<16x64xf32>, vector<64x4xf32>, vector<16x4xf32> -> vector<16x4xf32>
    %35 = tpu.reciprocal %33 : vector<16x1xf32> -> vector<16x1xf32>
    %36 = vector.broadcast %35 : vector<16x1xf32> to vector<16x4xf32>
    %37 = arith.mulf %34, %36 : vector<16x4xf32>
    %c0_14 = arith.constant 0 : index
    %c4_15 = arith.constant 4 : index
    %38 = vector.load %arg8[%c0_14, %c4_15] : memref<16x32xf32, #tpu.memory_space<vmem>>, vector<16x4xf32>
    tpu.vector_store %arg8[%c0_14, %c4_15], %37 {strides = array<i32>} : memref<16x32xf32, #tpu.memory_space<vmem>>, vector<16x4xf32>,
    %39 = arith.index_cast %4 : i32 to index
    %c8 = arith.constant 8 : index
    %40 = vector.load %arg7[%39, %c8] : memref<64x96xf32, #tpu.memory_space<vmem>>, vector<16x4xf32>
    %c0_16 = arith.constant 0 : index
    %c40 = arith.constant 40 : index
    %41 = vector.load %arg7[%c0_16, %c40] : memref<64x96xf32, #tpu.memory_space<vmem>>, vector<64x4xf32>
    %c0_17 = arith.constant 0 : index
    %c72 = arith.constant 72 : index
    %42 = vector.load %arg7[%c0_17, %c72] : memref<64x96xf32, #tpu.memory_space<vmem>>, vector<64x4xf32>
    %cst_18 = arith.constant dense<0.000000e+00> : vector<16x64xf32>
    %43 = tpu.matmul %40, %41, %cst_18 {dimension_numbers = #tpu.dot_dimension_numbers<[1], [1], [0], [0], [0, 0, 1, 0], [], []>} : vector<16x4xf32>, vector<64x4xf32>, vector<16x64xf32> -> vector<16x64xf32>
    %cst_19 = arith.constant dense<0xFF800000> : vector<16xf32>
    %44 = vector.multi_reduction <maximumf>, %43, %cst_19 [1] : vector<16x64xf32> to vector<16xf32>
    %45 = vector.shape_cast %44 : vector<16xf32> to vector<16x1xf32>
    %46 = vector.broadcast %45 : vector<16x1xf32> to vector<16x64xf32>
    %47 = arith.subf %43, %46 : vector<16x64xf32>
    %48 = math.exp %47 : vector<16x64xf32>
    %cst_20 = arith.constant dense<0.000000e+00> : vector<16xf32>
    %49 = vector.multi_reduction <add>, %48, %cst_20 [1] : vector<16x64xf32> to vector<16xf32>
    %50 = vector.shape_cast %49 : vector<16xf32> to vector<16x1xf32>
    %cst_21 = arith.constant dense<0.000000e+00> : vector<16x4xf32>
    %51 = tpu.matmul %48, %42, %cst_21 {dimension_numbers = #tpu.dot_dimension_numbers<[1], [0], [0], [1], [0, 0, 1, 1], [], []>} : vector<16x64xf32>, vector<64x4xf32>, vector<16x4xf32> -> vector<16x4xf32>
    %52 = tpu.reciprocal %50 : vector<16x1xf32> -> vector<16x1xf32>
    %53 = vector.broadcast %52 : vector<16x1xf32> to vector<16x4xf32>
    %54 = arith.mulf %51, %53 : vector<16x4xf32>
    %c0_22 = arith.constant 0 : index
    %c8_23 = arith.constant 8 : index
    %55 = vector.load %arg8[%c0_22, %c8_23] : memref<16x32xf32, #tpu.memory_space<vmem>>, vector<16x4xf32>
    tpu.vector_store %arg8[%c0_22, %c8_23], %54 {strides = array<i32>} : memref<16x32xf32, #tpu.memory_space<vmem>>, vector<16x4xf32>,
    %56 = arith.index_cast %4 : i32 to index
    %c12 = arith.constant 12 : index
    %57 = vector.load %arg7[%56, %c12] : memref<64x96xf32, #tpu.memory_space<vmem>>, vector<16x4xf32>
    %c0_24 = arith.constant 0 : index
    %c44 = arith.constant 44 : index
    %58 = vector.load %arg7[%c0_24, %c44] : memref<64x96xf32, #tpu.memory_space<vmem>>, vector<64x4xf32>
    %c0_25 = arith.constant 0 : index
    %c76 = arith.constant 76 : index
    %59 = vector.load %arg7[%c0_25, %c76] : memref<64x96xf32, #tpu.memory_space<vmem>>, vector<64x4xf32>
    %cst_26 = arith.constant dense<0.000000e+00> : vector<16x64xf32>
    %60 = tpu.matmul %57, %58, %cst_26 {dimension_numbers = #tpu.dot_dimension_numbers<[1], [1], [0], [0], [0, 0, 1, 0], [], []>} : vector<16x4xf32>, vector<64x4xf32>, vector<16x64xf32> -> vector<16x64xf32>
    %cst_27 = arith.constant dense<0xFF800000> : vector<16xf32>
    %61 = vector.multi_reduction <maximumf>, %60, %cst_27 [1] : vector<16x64xf32> to vector<16xf32>
    %62 = vector.shape_cast %61 : vector<16xf32> to vector<16x1xf32>
    %63 = vector.broadcast %62 : vector<16x1xf32> to vector<16x64xf32>
    %64 = arith.subf %60, %63 : vector<16x64xf32>
    %65 = math.exp %64 : vector<16x64xf32>
    %cst_28 = arith.constant dense<0.000000e+00> : vector<16xf32>
    %66 = vector.multi_reduction <add>, %65, %cst_28 [1] : vector<16x64xf32> to vector<16xf32>
    %67 = vector.shape_cast %66 : vector<16xf32> to vector<16x1xf32>
    %cst_29 = arith.constant dense<0.000000e+00> : vector<16x4xf32>
    %68 = tpu.matmul %65, %59, %cst_29 {dimension_numbers = #tpu.dot_dimension_numbers<[1], [0], [0], [1], [0, 0, 1, 1], [], []>} : vector<16x64xf32>, vector<64x4xf32>, vector<16x4xf32> -> vector<16x4xf32>
    %69 = tpu.reciprocal %67 : vector<16x1xf32> -> vector<16x1xf32>
    %70 = vector.broadcast %69 : vector<16x1xf32> to vector<16x4xf32>
    %71 = arith.mulf %68, %70 : vector<16x4xf32>
    %c0_30 = arith.constant 0 : index
    %c12_31 = arith.constant 12 : index
    %72 = vector.load %arg8[%c0_30, %c12_31] : memref<16x32xf32, #tpu.memory_space<vmem>>, vector<16x4xf32>
    tpu.vector_store %arg8[%c0_30, %c12_31], %71 {strides = array<i32>} : memref<16x32xf32, #tpu.memory_space<vmem>>, vector<16x4xf32>,
    %73 = arith.index_cast %4 : i32 to index
    %c16 = arith.constant 16 : index
    %74 = vector.load %arg7[%73, %c16] : memref<64x96xf32, #tpu.memory_space<vmem>>, vector<16x4xf32>
    %c0_32 = arith.constant 0 : index
    %c48 = arith.constant 48 : index
    %75 = vector.load %arg7[%c0_32, %c48] : memref<64x96xf32, #tpu.memory_space<vmem>>, vector<64x4xf32>
    %c0_33 = arith.constant 0 : index
    %c80 = arith.constant 80 : index
    %76 = vector.load %arg7[%c0_33, %c80] : memref<64x96xf32, #tpu.memory_space<vmem>>, vector<64x4xf32>
    %cst_34 = arith.constant dense<0.000000e+00> : vector<16x64xf32>
    %77 = tpu.matmul %74, %75, %cst_34 {dimension_numbers = #tpu.dot_dimension_numbers<[1], [1], [0], [0], [0, 0, 1, 0], [], []>} : vector<16x4xf32>, vector<64x4xf32>, vector<16x64xf32> -> vector<16x64xf32>
    %cst_35 = arith.constant dense<0xFF800000> : vector<16xf32>
    %78 = vector.multi_reduction <maximumf>, %77, %cst_35 [1] : vector<16x64xf32> to vector<16xf32>
    %79 = vector.shape_cast %78 : vector<16xf32> to vector<16x1xf32>
    %80 = vector.broadcast %79 : vector<16x1xf32> to vector<16x64xf32>
    %81 = arith.subf %77, %80 : vector<16x64xf32>
    %82 = math.exp %81 : vector<16x64xf32>
    %cst_36 = arith.constant dense<0.000000e+00> : vector<16xf32>
    %83 = vector.multi_reduction <add>, %82, %cst_36 [1] : vector<16x64xf32> to vector<16xf32>
    %84 = vector.shape_cast %83 : vector<16xf32> to vector<16x1xf32>
    %cst_37 = arith.constant dense<0.000000e+00> : vector<16x4xf32>
    %85 = tpu.matmul %82, %76, %cst_37 {dimension_numbers = #tpu.dot_dimension_numbers<[1], [0], [0], [1], [0, 0, 1, 1], [], []>} : vector<16x64xf32>, vector<64x4xf32>, vector<16x4xf32> -> vector<16x4xf32>
    %86 = tpu.reciprocal %84 : vector<16x1xf32> -> vector<16x1xf32>
    %87 = vector.broadcast %86 : vector<16x1xf32> to vector<16x4xf32>
    %88 = arith.mulf %85, %87 : vector<16x4xf32>
    %c0_38 = arith.constant 0 : index
    %c16_39 = arith.constant 16 : index
    %89 = vector.load %arg8[%c0_38, %c16_39] : memref<16x32xf32, #tpu.memory_space<vmem>>, vector<16x4xf32>
    tpu.vector_store %arg8[%c0_38, %c16_39], %88 {strides = array<i32>} : memref<16x32xf32, #tpu.memory_space<vmem>>, vector<16x4xf32>,
    %90 = arith.index_cast %4 : i32 to index
    %c20 = arith.constant 20 : index
    %91 = vector.load %arg7[%90, %c20] : memref<64x96xf32, #tpu.memory_space<vmem>>, vector<16x4xf32>
    %c0_40 = arith.constant 0 : index
    %c52 = arith.constant 52 : index
    %92 = vector.load %arg7[%c0_40, %c52] : memref<64x96xf32, #tpu.memory_space<vmem>>, vector<64x4xf32>
    %c0_41 = arith.constant 0 : index
    %c84 = arith.constant 84 : index
    %93 = vector.load %arg7[%c0_41, %c84] : memref<64x96xf32, #tpu.memory_space<vmem>>, vector<64x4xf32>
    %cst_42 = arith.constant dense<0.000000e+00> : vector<16x64xf32>
    %94 = tpu.matmul %91, %92, %cst_42 {dimension_numbers = #tpu.dot_dimension_numbers<[1], [1], [0], [0], [0, 0, 1, 0], [], []>} : vector<16x4xf32>, vector<64x4xf32>, vector<16x64xf32> -> vector<16x64xf32>
    %cst_43 = arith.constant dense<0xFF800000> : vector<16xf32>
    %95 = vector.multi_reduction <maximumf>, %94, %cst_43 [1] : vector<16x64xf32> to vector<16xf32>
    %96 = vector.shape_cast %95 : vector<16xf32> to vector<16x1xf32>
    %97 = vector.broadcast %96 : vector<16x1xf32> to vector<16x64xf32>
    %98 = arith.subf %94, %97 : vector<16x64xf32>
    %99 = math.exp %98 : vector<16x64xf32>
    %cst_44 = arith.constant dense<0.000000e+00> : vector<16xf32>
    %100 = vector.multi_reduction <add>, %99, %cst_44 [1] : vector<16x64xf32> to vector<16xf32>
    %101 = vector.shape_cast %100 : vector<16xf32> to vector<16x1xf32>
    %cst_45 = arith.constant dense<0.000000e+00> : vector<16x4xf32>
    %102 = tpu.matmul %99, %93, %cst_45 {dimension_numbers = #tpu.dot_dimension_numbers<[1], [0], [0], [1], [0, 0, 1, 1], [], []>} : vector<16x64xf32>, vector<64x4xf32>, vector<16x4xf32> -> vector<16x4xf32>
    %103 = tpu.reciprocal %101 : vector<16x1xf32> -> vector<16x1xf32>
    %104 = vector.broadcast %103 : vector<16x1xf32> to vector<16x4xf32>
    %105 = arith.mulf %102, %104 : vector<16x4xf32>
    %c0_46 = arith.constant 0 : index
    %c20_47 = arith.constant 20 : index
    %106 = vector.load %arg8[%c0_46, %c20_47] : memref<16x32xf32, #tpu.memory_space<vmem>>, vector<16x4xf32>
    tpu.vector_store %arg8[%c0_46, %c20_47], %105 {strides = array<i32>} : memref<16x32xf32, #tpu.memory_space<vmem>>, vector<16x4xf32>,
    %107 = arith.index_cast %4 : i32 to index
    %c24 = arith.constant 24 : index
    %108 = vector.load %arg7[%107, %c24] : memref<64x96xf32, #tpu.memory_space<vmem>>, vector<16x4xf32>
    %c0_48 = arith.constant 0 : index
    %c56 = arith.constant 56 : index
    %109 = vector.load %arg7[%c0_48, %c56] : memref<64x96xf32, #tpu.memory_space<vmem>>, vector<64x4xf32>
    %c0_49 = arith.constant 0 : index
    %c88 = arith.constant 88 : index
    %110 = vector.load %arg7[%c0_49, %c88] : memref<64x96xf32, #tpu.memory_space<vmem>>, vector<64x4xf32>
    %cst_50 = arith.constant dense<0.000000e+00> : vector<16x64xf32>
    %111 = tpu.matmul %108, %109, %cst_50 {dimension_numbers = #tpu.dot_dimension_numbers<[1], [1], [0], [0], [0, 0, 1, 0], [], []>} : vector<16x4xf32>, vector<64x4xf32>, vector<16x64xf32> -> vector<16x64xf32>
    %cst_51 = arith.constant dense<0xFF800000> : vector<16xf32>
    %112 = vector.multi_reduction <maximumf>, %111, %cst_51 [1] : vector<16x64xf32> to vector<16xf32>
    %113 = vector.shape_cast %112 : vector<16xf32> to vector<16x1xf32>
    %114 = vector.broadcast %113 : vector<16x1xf32> to vector<16x64xf32>
    %115 = arith.subf %111, %114 : vector<16x64xf32>
    %116 = math.exp %115 : vector<16x64xf32>
    %cst_52 = arith.constant dense<0.000000e+00> : vector<16xf32>
    %117 = vector.multi_reduction <add>, %116, %cst_52 [1] : vector<16x64xf32> to vector<16xf32>
    %118 = vector.shape_cast %117 : vector<16xf32> to vector<16x1xf32>
    %cst_53 = arith.constant dense<0.000000e+00> : vector<16x4xf32>
    %119 = tpu.matmul %116, %110, %cst_53 {dimension_numbers = #tpu.dot_dimension_numbers<[1], [0], [0], [1], [0, 0, 1, 1], [], []>} : vector<16x64xf32>, vector<64x4xf32>, vector<16x4xf32> -> vector<16x4xf32>
    %120 = tpu.reciprocal %118 : vector<16x1xf32> -> vector<16x1xf32>
    %121 = vector.broadcast %120 : vector<16x1xf32> to vector<16x4xf32>
    %122 = arith.mulf %119, %121 : vector<16x4xf32>
    %c0_54 = arith.constant 0 : index
    %c24_55 = arith.constant 24 : index
    %123 = vector.load %arg8[%c0_54, %c24_55] : memref<16x32xf32, #tpu.memory_space<vmem>>, vector<16x4xf32>
    tpu.vector_store %arg8[%c0_54, %c24_55], %122 {strides = array<i32>} : memref<16x32xf32, #tpu.memory_space<vmem>>, vector<16x4xf32>,
    %124 = arith.index_cast %4 : i32 to index
    %c28 = arith.constant 28 : index
    %125 = vector.load %arg7[%124, %c28] : memref<64x96xf32, #tpu.memory_space<vmem>>, vector<16x4xf32>
    %c0_56 = arith.constant 0 : index
    %c60 = arith.constant 60 : index
    %126 = vector.load %arg7[%c0_56, %c60] : memref<64x96xf32, #tpu.memory_space<vmem>>, vector<64x4xf32>
    %c0_57 = arith.constant 0 : index
    %c92 = arith.constant 92 : index
    %127 = vector.load %arg7[%c0_57, %c92] : memref<64x96xf32, #tpu.memory_space<vmem>>, vector<64x4xf32>
    %cst_58 = arith.constant dense<0.000000e+00> : vector<16x64xf32>
    %128 = tpu.matmul %125, %126, %cst_58 {dimension_numbers = #tpu.dot_dimension_numbers<[1], [1], [0], [0], [0, 0, 1, 0], [], []>} : vector<16x4xf32>, vector<64x4xf32>, vector<16x64xf32> -> vector<16x64xf32>
    %cst_59 = arith.constant dense<0xFF800000> : vector<16xf32>
    %129 = vector.multi_reduction <maximumf>, %128, %cst_59 [1] : vector<16x64xf32> to vector<16xf32>
    %130 = vector.shape_cast %129 : vector<16xf32> to vector<16x1xf32>
    %131 = vector.broadcast %130 : vector<16x1xf32> to vector<16x64xf32>
    %132 = arith.subf %128, %131 : vector<16x64xf32>
    %133 = math.exp %132 : vector<16x64xf32>
    %cst_60 = arith.constant dense<0.000000e+00> : vector<16xf32>
    %134 = vector.multi_reduction <add>, %133, %cst_60 [1] : vector<16x64xf32> to vector<16xf32>
    %135 = vector.shape_cast %134 : vector<16xf32> to vector<16x1xf32>
    %cst_61 = arith.constant dense<0.000000e+00> : vector<16x4xf32>
    %136 = tpu.matmul %133, %127, %cst_61 {dimension_numbers = #tpu.dot_dimension_numbers<[1], [0], [0], [1], [0, 0, 1, 1], [], []>} : vector<16x64xf32>, vector<64x4xf32>, vector<16x4xf32> -> vector<16x4xf32>
    %137 = tpu.reciprocal %135 : vector<16x1xf32> -> vector<16x1xf32>
    %138 = vector.broadcast %137 : vector<16x1xf32> to vector<16x4xf32>
    %139 = arith.mulf %136, %138 : vector<16x4xf32>
    %c0_62 = arith.constant 0 : index
    %c28_63 = arith.constant 28 : index
    %140 = vector.load %arg8[%c0_62, %c28_63] : memref<16x32xf32, #tpu.memory_space<vmem>>, vector<16x4xf32>
    tpu.vector_store %arg8[%c0_62, %c28_63], %139 {strides = array<i32>} : memref<16x32xf32, #tpu.memory_space<vmem>>, vector<16x4xf32>,
    %c0_64 = arith.constant 0 : index
    %c0_65 = arith.constant 0 : index
    %141 = vector.load %arg8[%c0_64, %c0_65] : memref<16x32xf32, #tpu.memory_space<vmem>>, vector<16x32xf32>
    %c0_66 = arith.constant 0 : index
    %c0_67 = arith.constant 0 : index
    %142 = vector.load %arg4[%c0_66, %c0_67] : memref<32x32xf32, #tpu.memory_space<vmem>>, vector<32x32xf32>
    %cst_68 = arith.constant dense<0.000000e+00> : vector<16x32xf32>
    %143 = tpu.matmul %141, %142, %cst_68 {dimension_numbers = #tpu.dot_dimension_numbers<[1], [0], [0], [1], [0, 0, 1, 1], [], []>} : vector<16x32xf32>, vector<32x32xf32>, vector<16x32xf32> -> vector<16x32xf32>
    %c0_69 = arith.constant 0 : index
    %c0_70 = arith.constant 0 : index
    %144 = vector.load %arg5[%c0_69, %c0_70] : memref<1x32xf32, #tpu.memory_space<vmem>>, vector<1x32xf32>
    %145 = vector.broadcast %144 : vector<1x32xf32> to vector<16x32xf32>
    %146 = arith.addf %143, %145 : vector<16x32xf32>
    %c0_71 = arith.constant 0 : index
    %c0_72 = arith.constant 0 : index
    %c0_73 = arith.constant 0 : index
    %147 = vector.load %arg6[%c0_71, %c0_72, %c0_73] : memref<1x16x32xf32, #tpu.memory_space<vmem>>, vector<1x16x32xf32>
    %148 = vector.shape_cast %147 : vector<1x16x32xf32> to vector<16x32xf32>
    %149 = vector.shape_cast %146 : vector<16x32xf32> to vector<1x16x32xf32>
    tpu.vector_store %arg6[%c0_71, %c0_72, %c0_73], %149 {strides = array<i32>} : memref<1x16x32xf32, #tpu.memory_space<vmem>>, vector<1x16x32xf32>,
    return
  }
  func.func @transform_0(%arg0: i32, %arg1: i32) -> (i32, i32, i32) {
    %c0_i32 = arith.constant 0 : i32
    %c0_i32_0 = arith.constant 0 : i32
    %c0_i32_1 = arith.constant 0 : i32
    return %arg0, %c0_i32, %c0_i32_0 : i32, i32, i32
  }
  func.func @transform_1(%arg0: i32, %arg1: i32) -> (i32, i32) {
    %c0_i32 = arith.constant 0 : i32
    %c0_i32_0 = arith.constant 0 : i32
    %c0_i32_1 = arith.constant 0 : i32
    return %c0_i32, %c0_i32_0 : i32, i32
  }
  func.func @transform_2(%arg0: i32, %arg1: i32) -> (i32, i32) {
    %c0_i32 = arith.constant 0 : i32
    %c0_i32_0 = arith.constant 0 : i32
    %c0_i32_1 = arith.constant 0 : i32
    return %c0_i32, %c0_i32_0 : i32, i32
  }
  func.func @transform_3(%arg0: i32, %arg1: i32) -> (i32, i32) {
    %c0_i32 = arith.constant 0 : i32
    %c0_i32_0 = arith.constant 0 : i32
    %c0_i32_1 = arith.constant 0 : i32
    return %c0_i32, %c0_i32_0 : i32, i32
  }
  func.func @transform_4(%arg0: i32, %arg1: i32) -> (i32, i32, i32) {
    %c0_i32 = arith.constant 0 : i32
    %c0_i32_0 = arith.constant 0 : i32
    return %arg0, %arg1, %c0_i32 : i32, i32, i32
  }
}

</mosaic_0001>

<bundles_post_ra>
// kernel: tpu_custom_call.1
= control target key start
LH: loop header
LB: loop body
LE: loop exit
PB: predicated region body
PF: predicated region fallthrough
CT: control target
= control target key end

     0   :  { %s4258_s15 = smov 0   ;;  %s4260_s16 = smov 0   ;;  %s4779_s0 = inlined_call_operand.vmem [shape: f32[2,64,32], index: 0, kind: input, shape index: {}]   ;;  %s4780_s1 = inlined_call_operand.vmem [shape: f32[32,96], index: 1, kind: input, shape index: {}]   ;;  %s4781_s2 = inlined_call_operand.vmem [shape: f32[32,32], index: 2, kind: input, shape index: {}]   ;;  %s4782_s3 = inlined_call_operand.vmem [shape: f32[1,32], index: 3, kind: input, shape index: {}]   ;;  %s4783_s4 = inlined_call_operand.vmem [shape: f32[2,64,32], index: 4, kind: output, shape index: {}]  }
   0x1   :  { %s4262_s17 = smov 0   ;;  %s4264_s18 = smov 0  }
   0x2   :  { %s4266_s19 = smov 0  }
   0x3 LB: > { %s23_s20 = sadd.s32 1, %s4193_s17  ;;  %s26_s21 = sadd.s32 1, %s4197_s18  ;;  %s4201_s19 = sphi %s4266_s19, %s14_s19   ;;  %s4197_s18 = sphi %s4264_s18, %s4789_s18   ;;  %s4193_s17 = sphi %s4262_s17, %s4788_s17   ;;  %s4189_s16 = sphi %s4260_s16, %s4787_s16   ;;  %s4185_s15 = sphi %s4258_s15, %s4786_s15  }
   0x4   : > { %p24_p0 = scmp.ge.s32.totalorder %s23_s20, 4  ;;  %p2738_p1 = scmp.ge.s32.totalorder %s4201_s19, 1 }
   0x5   : > { %p176_p2 = scmp.lt.s32.totalorder %s4201_s19, 9 }
   0x6   : > { %s4791_s20 = smov (%p24_p0, %s23_s20), 0  ;;  %s4793_s21 = smov (!%p24_p0, %s26_s21), %s4197_s18 }
   0x7   : > { %p177_p3 = pnand %p2738_p1, %p176_p2  ;;  %p28_p4 = scmp.ge.s32.totalorder %s4793_s21, 2 }
   0x8   : > { %p206_p5 = scmp.lt.s32.totalorder (!%p177_p3), %s4189_s16, 1  ;;  %s2741_s22 = sshll.u32 (!%p177_p3), %s4185_s15, 1 }
   0x9   : > { %s4795_s21 = smov (%p28_p4, %s4793_s21), 0  ;;  %180 = sbr.rel (%p177_p3) target bundleno = 4158 (0x103e), region = 36 }
   0xa   : > { %p214_p6 = scmp.lt.s32.totalorder (!%p177_p3), %s2741_s22, 7  ;;  %p2744_p7 = scmp.ne.s32.totalorder (!%p177_p3), %s4185_s15, 0 }
  0x10   : > { %s4797_s16 = smov (!%p206_p5, %s4189_s16), 1  ;;  %s4799_s22 = smov (!%p214_p6, %s2741_s22), 7 }
  0x11   : > { %s2855_s23 = sshll.u32 %s4797_s16, 6  ;;  %s2742_s24 = sshll.u32 %s4797_s16, 3  ;;  %v233_v0 = vld [vmem:[%s4780_s1] sm:$0xff] (!%p2744_p7)  ;;  %v234_v1 = vld [vmem:[%s4780_s1 + $0x8] sm:$0xff] (!%p2744_p7)  ;;  %v235_v2 = vld [vmem:[%s4780_s1 + $0x10] sm:$0xff] (!%p2744_p7)  ;;  %vm237_vm0 = vcmask (!%p2744_p7), 261120  }
  0x12   : > { %s4294_s27 = scalar_lea.vmem %s4779_s0, %s2855_s23  ;;  %s217_s28 = sadd.s32 %s2742_s24, %s4799_s22  ;;  %v3369_v3 = vpack.c.bf16 (!%p2744_p7), %v234_v1, %v233_v0  ;;  %v236_v4 = vld [vmem:[%s4780_s1 + $0x18] sm:$0xff] (!%p2744_p7)  ;;  %vm367_vm1 = vcmask (!%p2744_p7), 785408  }
  0x13   : > { %s2743_s29 = sshll.u32 %s217_s28, 3  ;;  %224 = sbr.rel (%p2744_p7) target bundleno = 247 (0xf7), region = 40  ;;  %v225_v5 = vld [vmem:[%s4294_s27] sm:$0xff] (!%p2744_p7)  ;;  %v3373_v7 = vpack.c.bf16 (!%p2744_p7), %v236_v4, %v235_v2  ;;  %v226_v8 = vld [vmem:[%s4294_s27 + $0x8] sm:$0xff] (!%p2744_p7)  ;;  %v227_v10 = vld [vmem:[%s4294_s27 + $0x10] sm:$0xff] (!%p2744_p7) }
  0x14   : > { %s4299_s6 = scalar_lea.vmem %s4783_s4, %s2743_s29  ;;  %v229_v6 = vld [vmem:[%s4294_s27 + $0x20] sm:$0xff] (!%p2744_p7)  ;;  %3042 = vmatprep.mubr.msk.f32.mxu0 (!%p2744_p7), %vm237_vm0, %v225_v5  ;;  %3370 = vmatprep.subr.bf16.mxu0 (!%p2744_p7), %v3369_v3  ;;  %v230_v9 = vld [vmem:[%s4294_s27 + $0x28] sm:$0xff] (!%p2744_p7)  ;;  %v231_v11 = vld [vmem:[%s4294_s27 + $0x30] sm:$0xff] (!%p2744_p7) }
  0x15   : > { %3048 = vmatprep.mubr.msk.f32.mxu1 (!%p2744_p7), %vm237_vm0, %v229_v6  ;;  %3705 = vmatprep.subr.bf16.mxu1 (!%p2744_p7), %v3369_v3  ;;  %v228_v12 = vld [vmem:[%s4294_s27 + $0x18] sm:$0xff] (!%p2744_p7) }
  0x16   : > { %3372 = vmatpush3.bf16.msra.mxu0 (!%p2744_p7), %v3369_v3  ;;  %3707 = vmatpush3.bf16.msra.mxu1 (!%p2744_p7), %v3369_v3  ;;  %v232_v13 = vld [vmem:[%s4294_s27 + $0x38] sm:$0xff] (!%p2744_p7) }
  0x17   : > { %3374 = vmatprep.subr.bf16.mxu0 (!%p2744_p7), %v3373_v7  ;;  %3706 = vmatprep.subr.bf16.mxu1 (!%p2744_p7), %v3373_v7 }
  0x1a   : > { %3376 = vmatpush3.bf16.msra.mxu0 %v3373_v7  ;;  %3708 = vmatpush3.bf16.msra.mxu1 %v3373_v7 }
  0x1d   : > { %3043 = vmatmul.mubr.msk.f32.vlgmr.msra.gmra.mrb[0].mxu0 %vm237_vm0, %v226_v8  ;;  %3049 = vmatmul.mubr.msk.f32.vlgmr.msra.gmra.mrb[0].mxu1 %vm237_vm0, %v230_v9 }
  0x1e   : > { %3045 = vmatprep.mubr.msk.f32.mxu0 %vm237_vm0, %v227_v10  ;;  %3051 = vmatprep.mubr.msk.f32.mxu1 %vm237_vm0, %v231_v11 }
  0x21   : > { %3046 = vmatmul.mubr.msk.f32.gmra.mrb[2].mxu0 %vm237_vm0, %v228_v12  ;;  %3052 = vmatmul.mubr.msk.f32.gmra.mrb[2].mxu1 %vm237_vm0, %v232_v13 }
  0xf0   : > { %v3044_v14 = vpop.f32.mrb[0].mxu0  ;;  %v3050_v15 = vpop.f32.mrb[0].mxu1 }
  0xf1   : > { %369 = vst.msk [vmem:[#allocation2 + $0x8] sm:$0xff] %vm367_vm1, %v3044_v14  ;;  %373 = vst.msk [vmem:[#allocation2 + $0x28] sm:$0xff] %vm367_vm1, %v3050_v15  ;;  %v328_v16 = vpop.f32.mrb[1].mxu0  ;;  %v348_v17 = vpop.f32.mrb[1].mxu1 }
  0xf2   : > { %368 = vst.msk [vmem:[#allocation2] sm:$0xff] %vm367_vm1, %v328_v16  ;;  %372 = vst.msk [vmem:[#allocation2 + $0x20] sm:$0xff] %vm367_vm1, %v348_v17 }
  0xf4   : > { %v3047_v18 = vpop.f32.mrb[2].mxu0  ;;  %v3053_v19 = vpop.f32.mrb[2].mxu1 }
  0xf5   : > { %371 = vst.msk [vmem:[#allocation2 + $0x18] sm:$0xff] %vm367_vm1, %v3047_v18  ;;  %375 = vst.msk [vmem:[#allocation2 + $0x38] sm:$0xff] %vm367_vm1, %v3053_v19  ;;  %v338_v20 = vpop.f32.mrb[3].mxu0  ;;  %v358_v21 = vpop.f32.mrb[3].mxu1 }
  0xf6   : > { %370 = vst.msk [vmem:[#allocation2 + $0x10] sm:$0xff] %vm367_vm1, %v338_v20  ;;  %374 = vst.msk [vmem:[#allocation2 + $0x30] sm:$0xff] %vm367_vm1, %v358_v21 }
  0xf7 PF: > { %s4203_s16 = smov 96   ;;  %s2753_s22 = sshll.u32 %s4185_s15, 4  ;;  %vm412_vm2 = vcmask 31744   ;;  %vm510_vm4 = vcmask 523264   ;;  %vm910_vm5 = vcmask 64544   ;;  %vm1183_vm6 = vcmask 97344  }
  0xf8   : > { %v381_v23 = vld [vmem:[#allocation2 + $0x8] sm:$0xff]  ;;  %s4351_s23 = scalar_lea.vmem [#allocation2], %s2753_s22  ;;  %s4204_s24 = smov 64   ;;  %vm4364_vm3 = vmpackc.low %vm412_vm2, %vm412_vm2  ;;  %vm1456_vm7 = vcmask 130144   ;;  %vm1729_vm8 = vcmask 162944   ;;  %vm2002_vm9 = vcmask 195744  }
  0xf9   : > { %v380_v22 = vld [vmem:[#allocation2] sm:$0xff]  ;;  %v385_v28 = vld [vmem:[#allocation2 + $0x28] sm:$0xff]  ;;  %s4205_s15 = smov 92   ;;  %s4206_s25 = smov 124   ;;  %vm2275_vm10 = vcmask 228544   ;;  %vm2548_vm11 = vcmask 261344  }
  0xfa   : > { %v4338_v25 = vpack.i.bf16 %v381_v23, %v380_v22  ;;  %v384_v27 = vld [vmem:[#allocation2 + $0x20] sm:$0xff]  ;;  %s4207_s26 = smov 60   ;;  %s4208_s27 = smov 88   ;;  %vm2564_vm12 = vcmask 261120  }
  0xfb   : > { %v4340_v29 = vpack.i.bf16 %v385_v28, %v384_v27  ;;  %s4209_s28 = smov 120   ;;  %s4210_s29 = smov 56  }
  0xfc   : > { %v383_v26 = vld [vmem:[#allocation2 + $0x18] sm:$0xff]  ;;  %3780 = vrot.lane.b32.xlu0 %v4338_v25, %s4203_s16  ;;  %s4211_s30 = smov 84   ;;  %s4212_s5 = smov 116  }
  0xfd   : > { %v382_v24 = vld [vmem:[#allocation2 + $0x10] sm:$0xff]  ;;  %v387_v31 = vld [vmem:[#allocation2 + $0x38] sm:$0xff]  ;;  %3790 = vrot.lane.b32.xlu1 %v4340_v29, %s4203_s16  ;;  %v4354_v34 = vld [vmem:[%s4351_s23] sm:$0xff]  ;;  %s4213_s7 = smov 52   ;;  %s4214_s8 = smov 80  }
  0xfe   : > { %v386_v30 = vld [vmem:[#allocation2 + $0x30] sm:$0xff]  ;;  %v4343_v32 = vpack.i.bf16 %v383_v26, %v382_v24  ;;  %3070 = vmatprep.mubr.msk.f32.mxu0 %vm412_vm2, %v4354_v34  ;;  %v4385_v52 = vld [vmem:[%s4351_s23 + $0x8] sm:$0xff]  ;;  %s4215_s9 = smov 112   ;;  %s4216_s10 = smov 48  }
  0xff   : > { %v4346_v33 = vpack.i.bf16 %v387_v31, %v386_v30  ;;  %s4217_s11 = smov 76   ;;  %s4218_s12 = smov 108  }
 0x100   : > { %3785 = vrot.lane.b32.xlu0 %v4343_v32, %s4203_s16  ;;  %s4219_s13 = smov 44   ;;  %s4220_s14 = smov 72  }
 0x101   : > { %3795 = vrot.lane.b32.xlu1 %v4346_v33, %s4203_s16  ;;  %s4221_s16 = smov 104   ;;  %s4222_s22 = smov 40  }
 0x104   : > { %3800 = vrot.lane.b32.xlu0 %v4338_v25, %s4204_s24 }
 0x105   : > { %3805 = vrot.lane.b32.xlu1 %v4343_v32, %s4204_s24 }
 0x108   : > { %3810 = vrot.lane.b32.xlu0 %v4340_v29, %s4204_s24 }
 0x109   : > { %3815 = vrot.lane.b32.xlu1 %v4346_v33, %s4204_s24  ;;  %s4224_s24 = smov 100  }
 0x16e   : > { %v3781_v35 = vpop.permute.xlu0 %3780 }
 0x16f   : > { %v3783_v36 = vunpack.i.h.bf16 %v3781_v35  ;;  %v3782_v37 = vunpack.i.l.bf16 %v3781_v35  ;;  %v3791_v41 = vpop.permute.xlu1 %3790 }
 0x170   : > { %v3793_v45 = vunpack.i.h.bf16 %v3791_v41  ;;  %v3792_v46 = vunpack.i.l.bf16 %v3791_v41 }
 0x171   : > { %v3377_v39 = vpack.c.bf16 %v3783_v36, %v3782_v37 }
 0x172   : > { %v3786_v40 = vpop.permute.xlu0 %3785  ;;  %v3389_v47 = vpack.c.bf16 %v3793_v45, %v3792_v46 }
 0x173   : > { %3379 = vmatprep.subr.msk.bf16.mxu0 %vm4364_vm3, %v3377_v39  ;;  %v3788_v42 = vunpack.i.h.bf16 %v3786_v40  ;;  %v3787_v43 = vunpack.i.l.bf16 %v3786_v40  ;;  %v3796_v48 = vpop.permute.xlu1 %3795 }
 0x174   : > { %3382 = vmatpush3.bf16.xpose.msk.msra.mxu0 %vm4364_vm3, %v3377_v39  ;;  %v3798_v49 = vunpack.i.h.bf16 %v3796_v48  ;;  %v3797_v50 = vunpack.i.l.bf16 %v3796_v48 }
 0x175   : > { %v3383_v44 = vpack.c.bf16 %v3788_v42, %v3787_v43 }
 0x176   : > { %v3395_v51 = vpack.c.bf16 %v3798_v49, %v3797_v50  ;;  %v3801_v53 = vpop.permute.xlu0 %3800 }
 0x177   : > { %3385 = vmatprep.subr.msk.bf16.mxu0 %vm4364_vm3, %v3383_v44  ;;  %v3806_v54 = vpop.permute.xlu1 %3805  ;;  %v3803_v57 = vunpack.i.h.bf16 %v3801_v53  ;;  %v3802_v58 = vunpack.i.l.bf16 %v3801_v53 }
 0x178   : > { %v3808_v55 = vunpack.i.h.bf16 %v3806_v54  ;;  %v3807_v56 = vunpack.i.l.bf16 %v3806_v54 }
 0x179   : > { %v3401_v59 = vpack.c.bf16 %v3803_v57, %v3802_v58 }
 0x17a   : > { %v3811_v60 = vpop.permute.xlu0 %3810  ;;  %v3405_v61 = vpack.c.bf16 %v3808_v55, %v3807_v56 }
 0x17b   : > { %v3816_v62 = vpop.permute.xlu1 %3815  ;;  %3402 = vmatprep.subr.bf16.mxu1 %v3401_v59  ;;  %v3813_v63 = vunpack.i.h.bf16 %v3811_v60  ;;  %v3812_v0 = vunpack.i.l.bf16 %v3811_v60 }
 0x17c   : > { %3388 = vmatpush3.bf16.xpose.msk.msra.mxu0 %vm4364_vm3, %v3383_v44  ;;  %3404 = vmatpush3.bf16.msra.mxu1 %v3401_v59  ;;  %v3818_v1 = vunpack.i.h.bf16 %v3816_v62  ;;  %v3817_v2 = vunpack.i.l.bf16 %v3816_v62 }
 0x17d   : > { %3391 = vmatprep.subr.msk.bf16.mxu0 %vm4364_vm3, %v3389_v47  ;;  %3406 = vmatprep.subr.bf16.mxu1 %v3405_v61  ;;  %v3409_v3 = vpack.c.bf16 %v3813_v63, %v3812_v0 }
 0x17e   : > { %v3413_v4 = vpack.c.bf16 %v3818_v1, %v3817_v2 }
 0x180   : > { %3408 = vmatpush3.bf16.msra.mxu1 %v3405_v61 }
 0x181   : > { %3410 = vmatprep.subr.bf16.mxu1 %v3409_v3 }
 0x184   : > { %3394 = vmatpush3.bf16.xpose.msk.msra.mxu0 %vm4364_vm3, %v3389_v47  ;;  %3412 = vmatpush3.bf16.msra.mxu1 %v3409_v3 }
 0x185   : > { %3397 = vmatprep.subr.msk.bf16.mxu0 %vm4364_vm3, %v3395_v51  ;;  %3414 = vmatprep.subr.bf16.mxu1 %v3413_v4 }
 0x188   : > { %3416 = vmatpush3.bf16.msra.mxu1 %v3413_v4 }
 0x18c   : > { %3400 = vmatpush3.bf16.xpose.msk.msra.mxu0 %vm4364_vm3, %v3395_v51 }
 0x193   : > { %3071 = vmatmul.mubr.msk.f32.vlgmr.msra.gmra.mrb[0].mxu0 %vm412_vm2, %v4385_v52 }
 0x266   : > { %v3072_v5 = vpop.f32.mrb[0].mxu0 }
 0x267   : > { %v501_v6 = vpop.f32.mrb[1].mxu0  ;;  %v514_v7 = vsel %vm510_vm4, %v3072_v5, -inf }
 0x268   : > { %515 = vmax.xlane.f32.xlu1 %v514_v7  ;;  %v511_v8 = vsel %vm510_vm4, %v501_v6, -inf }
 0x269   : > { %512 = vmax.xlane.f32.xlu0 %v511_v8 }
 0x279   : > { %3825 = vrot.lane.b32.xlu1 %v4343_v32, %s4205_s15 }
 0x27d   : > { %3835 = vrot.lane.b32.xlu1 %v4346_v33, %s4205_s15 }
 0x27f   : > { %3820 = vrot.lane.b32.xlu0 %v4338_v25, %s4205_s15 }
 0x281   : > { %654 = vrot.lane.b32.xlu1 %v4385_v52, %s4206_s25 }
 0x283   : > { %3830 = vrot.lane.b32.xlu0 %v4340_v29, %s4205_s15  ;;  %s4225_s15 = smov 36  }
 0x285   : > { %3845 = vrot.lane.b32.xlu1 %v4343_v32, %s4207_s26 }
 0x287   : > { %652 = vrot.lane.b32.xlu0 %v4354_v34, %s4206_s25  ;;  %s4226_s25 = smov 4  }
 0x289   : > { %3855 = vrot.lane.b32.xlu1 %v4346_v33, %s4207_s26 }
 0x28b   : > { %3840 = vrot.lane.b32.xlu0 %v4338_v25, %s4207_s26 }
 0x28f   : > { %3850 = vrot.lane.b32.xlu0 %v4340_v29, %s4207_s26  ;;  %s4227_s26 = smov 12  }
 0x2f5   : > { %v516_v9 = vpop.xlane.xlu1 %515 }
 0x2f6   : > { %v518_v10 = vsub.f32 %v3072_v5, %v516_v9  ;;  %v513_v11 = vpop.xlane.xlu0 %512 }
 0x2f7   : > { %v517_v12 = vsub.f32 %v501_v6, %v513_v11 }
 0x2f8   : > { %v521_v13 = vmul.f32 1.442695, %v518_v10 }
 0x2f9   : > { %v519_v14 = vmul.f32 1.442695, %v517_v12  ;;  %v3826_v19 = vpop.permute.xlu1 %3825 }
 0x2fa   : > { %v3821_v15 = vpop.permute.xlu0 %3820  ;;  %v3828_v20 = vunpack.i.h.bf16 %v3826_v19  ;;  %v3827_v21 = vunpack.i.l.bf16 %v3826_v19 }
 0x2fb   : > { %4099 = vpow2.f32 %v519_v14  ;;  %v3823_v16 = vunpack.i.h.bf16 %v3821_v15  ;;  %v3822_v17 = vunpack.i.l.bf16 %v3821_v15 }
 0x2fc   : > { %4101 = vpow2.f32 %v521_v13  ;;  %v3423_v24 = vpack.c.bf16 %v3828_v20, %v3827_v21 }
 0x2fd   : > { %v3417_v18 = vpack.c.bf16 %v3823_v16, %v3822_v17  ;;  %v3836_v35 = vpop.permute.xlu1 %3835 }
 0x2fe   : > { %v3831_v22 = vpop.permute.xlu0 %3830  ;;  %v3838_v36 = vunpack.i.h.bf16 %v3836_v35  ;;  %v3837_v37 = vunpack.i.l.bf16 %v3836_v35 }
 0x2ff   : > { %3419 = vmatprep.subr.msk.bf16.mxu1 %vm4364_vm3, %v3417_v18  ;;  %v3833_v28 = vunpack.i.h.bf16 %v3831_v22  ;;  %v3832_v30 = vunpack.i.l.bf16 %v3831_v22 }
 0x300   : > { %v3435_v39 = vpack.c.bf16 %v3838_v36, %v3837_v37 }
 0x301   : > { %v3429_v31 = vpack.c.bf16 %v3833_v28, %v3832_v30  ;;  %v655_v40 = vpop.permute.xlu1 %654 }
 0x302   : > { %v653_v26 = vpop.permute.xlu0 %652 }
 0x305   : > { %v4403_v23 = vpop.eup %4099  ;;  %v3846_v42 = vpop.permute.xlu1 %3845 }
 0x306   : > { %v4405_v27 = vpop.eup %4101  ;;  %3089 = vmatprep.mubr.msk.f32.mxu1 %vm510_vm4, %v4403_v23  ;;  %v3841_v41 = vpop.permute.xlu0 %3840  ;;  %v3848_v45 = vunpack.i.h.bf16 %v3846_v42  ;;  %v3847_v46 = vunpack.i.l.bf16 %v3846_v42 }
 0x307   : > { %3090 = vmatmul.mubr.msk.f32.vlgmr.msra.gmra.mrb[0].mxu1 %vm510_vm4, %v4405_v27  ;;  %v3843_v43 = vunpack.i.h.bf16 %v3841_v41  ;;  %v3842_v44 = vunpack.i.l.bf16 %v3841_v41 }
 0x308   : > { %3422 = vmatpush3.bf16.xpose.msk.msra.mxu1 %vm4364_vm3, %v3417_v18  ;;  %3108 = vmatprep.mubr.msk.f32.mxu1 %vm412_vm2, %v653_v26  ;;  %v3445_v49 = vpack.c.bf16 %v3848_v45, %v3847_v46 }
 0x309   : > { %3425 = vmatprep.subr.msk.bf16.mxu1 %vm4364_vm3, %v3423_v24  ;;  %v3441_v47 = vpack.c.bf16 %v3843_v43, %v3842_v44  ;;  %v3856_v50 = vpop.permute.xlu1 %3855 }
 0x30a   : > { %v3851_v48 = vpop.permute.xlu0 %3850  ;;  %v3858_v54 = vunpack.i.h.bf16 %v3856_v50  ;;  %v3857_v55 = vunpack.i.l.bf16 %v3856_v50 }
 0x30b   : > { %3442 = vmatprep.subr.bf16.mxu0 %v3441_v47  ;;  %v3853_v51 = vunpack.i.h.bf16 %v3851_v48  ;;  %v3852_v53 = vunpack.i.l.bf16 %v3851_v48 }
 0x30c   : > { %3444 = vmatpush3.bf16.msra.mxu0 %v3441_v47  ;;  %v3453_v57 = vpack.c.bf16 %v3858_v54, %v3857_v55 }
 0x30d   : > { %3446 = vmatprep.subr.bf16.mxu0 %v3445_v49  ;;  %v3449_v56 = vpack.c.bf16 %v3853_v51, %v3852_v53 }
 0x310   : > { %3428 = vmatpush3.bf16.xpose.msk.msra.mxu1 %vm4364_vm3, %v3423_v24  ;;  %3448 = vmatpush3.bf16.msra.mxu0 %v3445_v49 }
 0x311   : > { %3431 = vmatprep.subr.msk.bf16.mxu1 %vm4364_vm3, %v3429_v31  ;;  %3450 = vmatprep.subr.bf16.mxu0 %v3449_v56 }
 0x314   : > { %3452 = vmatpush3.bf16.msra.mxu0 %v3449_v56 }
 0x315   : > { %3454 = vmatprep.subr.bf16.mxu0 %v3453_v57 }
 0x318   : > { %3434 = vmatpush3.bf16.xpose.msk.msra.mxu1 %vm4364_vm3, %v3429_v31  ;;  %3456 = vmatpush3.bf16.msra.mxu0 %v3453_v57 }
 0x319   : > { %3437 = vmatprep.subr.msk.bf16.mxu1 %vm4364_vm3, %v3435_v39 }
 0x320   : > { %3440 = vmatpush3.bf16.xpose.msk.msra.mxu1 %vm4364_vm3, %v3435_v39 }
 0x327   : > { %3109 = vmatmul.mubr.msk.f32.vlgmr.msra.gmra.mrb[2].mxu1 %vm412_vm2, %v655_v40 }
 0x3da   : > { %v4427_v58 = vpop.f32.mrb[0].mxu1 }
 0x3db   : > { %v4429_v59 = vpop.f32.mrb[1].mxu1 }
 0x3fa   : > { %v3110_v60 = vpop.f32.mrb[2].mxu1 }
 0x3fb   : > { %v766_v61 = vpop.f32.mrb[3].mxu1  ;;  %v778_v62 = vsel %vm510_vm4, %v3110_v60, -inf }
 0x3fc   : > { %779 = vmax.xlane.f32.xlu1 %v778_v62  ;;  %v775_v63 = vsel %vm510_vm4, %v766_v61, -inf }
 0x3fd   : > { %776 = vmax.xlane.f32.xlu0 %v775_v63 }
 0x40d   : > { %3865 = vrot.lane.b32.xlu1 %v4343_v32, %s4208_s27 }
 0x411   : > { %3875 = vrot.lane.b32.xlu1 %v4346_v33, %s4208_s27 }
 0x413   : > { %3860 = vrot.lane.b32.xlu0 %v4338_v25, %s4208_s27 }
 0x415   : > { %927 = vrot.lane.b32.xlu1 %v4385_v52, %s4209_s28 }
 0x417   : > { %3870 = vrot.lane.b32.xlu0 %v4340_v29, %s4208_s27  ;;  %s4228_s27 = smov 8  }
 0x419   : > { %3885 = vrot.lane.b32.xlu1 %v4343_v32, %s4210_s29 }
 0x41b   : > { %925 = vrot.lane.b32.xlu0 %v4354_v34, %s4209_s28  ;;  %s4229_s28 = smov 16  }
 0x41d   : > { %3895 = vrot.lane.b32.xlu1 %v4346_v33, %s4210_s29 }
 0x41f   : > { %3880 = vrot.lane.b32.xlu0 %v4338_v25, %s4210_s29 }
 0x423   : > { %3890 = vrot.lane.b32.xlu0 %v4340_v29, %s4210_s29  ;;  %s4230_s29 = smov 20  }
 0x489   : > { %v780_v0 = vpop.xlane.xlu1 %779 }
 0x48a   : > { %v782_v1 = vsub.f32 %v3110_v60, %v780_v0  ;;  %v777_v2 = vpop.xlane.xlu0 %776 }
 0x48b   : > { %v781_v3 = vsub.f32 %v766_v61, %v777_v2 }
 0x48c   : > { %v785_v4 = vmul.f32 1.442695, %v782_v1 }
 0x48d   : > { %v783_v5 = vmul.f32 1.442695, %v781_v3  ;;  %v3866_v10 = vpop.permute.xlu1 %3865 }
 0x48e   : > { %v3861_v6 = vpop.permute.xlu0 %3860  ;;  %v3868_v11 = vunpack.i.h.bf16 %v3866_v10  ;;  %v3867_v12 = vunpack.i.l.bf16 %v3866_v10 }
 0x48f   : > { %4103 = vpow2.f32 %v783_v5  ;;  %v3863_v7 = vunpack.i.h.bf16 %v3861_v6  ;;  %v3862_v8 = vunpack.i.l.bf16 %v3861_v6 }
 0x490   : > { %4105 = vpow2.f32 %v785_v4  ;;  %v3463_v15 = vpack.c.bf16 %v3868_v11, %v3867_v12 }
 0x491   : > { %v3457_v9 = vpack.c.bf16 %v3863_v7, %v3862_v8  ;;  %v3876_v21 = vpop.permute.xlu1 %3875 }
 0x492   : > { %v3871_v13 = vpop.permute.xlu0 %3870  ;;  %v3878_v22 = vunpack.i.h.bf16 %v3876_v21  ;;  %v3877_v24 = vunpack.i.l.bf16 %v3876_v21 }
 0x493   : > { %3459 = vmatprep.subr.msk.bf16.mxu0 %vm4364_vm3, %v3457_v9  ;;  %v3873_v18 = vunpack.i.h.bf16 %v3871_v13  ;;  %v3872_v19 = vunpack.i.l.bf16 %v3871_v13 }
 0x494   : > { %v3475_v26 = vpack.c.bf16 %v3878_v22, %v3877_v24 }
 0x495   : > { %v3469_v20 = vpack.c.bf16 %v3873_v18, %v3872_v19  ;;  %v928_v28 = vpop.permute.xlu1 %927 }
 0x496   : > { %v926_v16 = vpop.permute.xlu0 %925 }
 0x499   : > { %v4445_v14 = vpop.eup %4103  ;;  %v3886_v31 = vpop.permute.xlu1 %3885 }
 0x49a   : > { %v4447_v17 = vpop.eup %4105  ;;  %3127 = vmatprep.mubr.msk.f32.mxu0 %vm510_vm4, %v4445_v14  ;;  %v3881_v30 = vpop.permute.xlu0 %3880  ;;  %v3888_v37 = vunpack.i.h.bf16 %v3886_v31  ;;  %v3887_v39 = vunpack.i.l.bf16 %v3886_v31 }
 0x49b   : > { %3128 = vmatmul.mubr.msk.f32.vlgmr.msra.gmra.mrb[2].mxu0 %vm510_vm4, %v4447_v17  ;;  %v3883_v35 = vunpack.i.h.bf16 %v3881_v30  ;;  %v3882_v36 = vunpack.i.l.bf16 %v3881_v30 }
 0x49c   : > { %3462 = vmatpush3.bf16.xpose.msk.msra.mxu0 %vm4364_vm3, %v3457_v9  ;;  %3146 = vmatprep.mubr.msk.f32.mxu0 %vm412_vm2, %v926_v16  ;;  %v3485_v41 = vpack.c.bf16 %v3888_v37, %v3887_v39 }
 0x49d   : > { %3465 = vmatprep.subr.msk.bf16.mxu0 %vm4364_vm3, %v3463_v15  ;;  %v3481_v40 = vpack.c.bf16 %v3883_v35, %v3882_v36  ;;  %v3896_v43 = vpop.permute.xlu1 %3895 }
 0x49e   : > { %v3891_v42 = vpop.permute.xlu0 %3890  ;;  %v3898_v47 = vunpack.i.h.bf16 %v3896_v43  ;;  %v3897_v48 = vunpack.i.l.bf16 %v3896_v43 }
 0x49f   : > { %3482 = vmatprep.subr.bf16.mxu1 %v3481_v40  ;;  %v3893_v44 = vunpack.i.h.bf16 %v3891_v42  ;;  %v3892_v45 = vunpack.i.l.bf16 %v3891_v42 }
 0x4a0   : > { %3484 = vmatpush3.bf16.msra.mxu1 %v3481_v40  ;;  %v3493_v49 = vpack.c.bf16 %v3898_v47, %v3897_v48 }
 0x4a1   : > { %v3489_v46 = vpack.c.bf16 %v3893_v44, %v3892_v45  ;;  %3486 = vmatprep.subr.bf16.mxu1 %v3485_v41 }
 0x4a4   : > { %3468 = vmatpush3.bf16.xpose.msk.msra.mxu0 %vm4364_vm3, %v3463_v15  ;;  %3488 = vmatpush3.bf16.msra.mxu1 %v3485_v41 }
 0x4a5   : > { %3471 = vmatprep.subr.msk.bf16.mxu0 %vm4364_vm3, %v3469_v20  ;;  %3490 = vmatprep.subr.bf16.mxu1 %v3489_v46 }
 0x4a8   : > { %3492 = vmatpush3.bf16.msra.mxu1 %v3489_v46 }
 0x4a9   : > { %3494 = vmatprep.subr.bf16.mxu1 %v3493_v49 }
 0x4ac   : > { %3474 = vmatpush3.bf16.xpose.msk.msra.mxu0 %vm4364_vm3, %v3469_v20  ;;  %3496 = vmatpush3.bf16.msra.mxu1 %v3493_v49 }
 0x4ad   : > { %3477 = vmatprep.subr.msk.bf16.mxu0 %vm4364_vm3, %v3475_v26 }
 0x4b4   : > { %3480 = vmatpush3.bf16.xpose.msk.msra.mxu0 %vm4364_vm3, %v3475_v26 }
 0x4bb   : > { %3147 = vmatmul.mubr.msk.f32.vlgmr.msra.gmra.mrb[4].mxu0 %vm412_vm2, %v928_v28 }
 0x56e   : > { %v4469_v50 = vpop.f32.mrb[2].mxu0 }
 0x56f   : > { %v4471_v51 = vpop.f32.mrb[3].mxu0 }
 0x58e   : > { %v3148_v53 = vpop.f32.mrb[4].mxu0 }
 0x58f   : > { %v1039_v54 = vpop.f32.mrb[5].mxu0  ;;  %v1051_v55 = vsel %vm510_vm4, %v3148_v53, -inf }
 0x590   : > { %1052 = vmax.xlane.f32.xlu1 %v1051_v55  ;;  %v1048_v56 = vsel %vm510_vm4, %v1039_v54, -inf }
 0x591   : > { %1049 = vmax.xlane.f32.xlu0 %v1048_v56 }
 0x5a1   : > { %3905 = vrot.lane.b32.xlu1 %v4343_v32, %s4211_s30 }
 0x5a5   : > { %3915 = vrot.lane.b32.xlu1 %v4346_v33, %s4211_s30 }
 0x5a7   : > { %3900 = vrot.lane.b32.xlu0 %v4338_v25, %s4211_s30 }
 0x5a9   : > { %1200 = vrot.lane.b32.xlu1 %v4385_v52, %s4212_s5 }
 0x5ab   : > { %3910 = vrot.lane.b32.xlu0 %v4340_v29, %s4211_s30  ;;  %s4231_s30 = smov 24  }
 0x5ad   : > { %3925 = vrot.lane.b32.xlu1 %v4343_v32, %s4213_s7 }
 0x5af   : > { %1198 = vrot.lane.b32.xlu0 %v4354_v34, %s4212_s5 }
 0x5b1   : > { %3935 = vrot.lane.b32.xlu1 %v4346_v33, %s4213_s7 }
 0x5b3   : > { %3920 = vrot.lane.b32.xlu0 %v4338_v25, %s4213_s7 }
 0x5b7   : > { %3930 = vrot.lane.b32.xlu0 %v4340_v29, %s4213_s7 }
 0x61d   : > { %v1053_v57 = vpop.xlane.xlu1 %1052 }
 0x61e   : > { %v1055_v60 = vsub.f32 %v3148_v53, %v1053_v57  ;;  %v1050_v61 = vpop.xlane.xlu0 %1049 }
 0x61f   : > { %v1054_v62 = vsub.f32 %v1039_v54, %v1050_v61 }
 0x620   : > { %v1058_v63 = vmul.f32 1.442695, %v1055_v60 }
 0x621   : > { %v1056_v0 = vmul.f32 1.442695, %v1054_v62  ;;  %v3906_v5 = vpop.permute.xlu1 %3905 }
 0x622   : > { %v3901_v1 = vpop.permute.xlu0 %3900  ;;  %v3908_v6 = vunpack.i.h.bf16 %v3906_v5  ;;  %v3907_v7 = vunpack.i.l.bf16 %v3906_v5 }
 0x623   : > { %4107 = vpow2.f32 %v1056_v0  ;;  %v3903_v2 = vunpack.i.h.bf16 %v3901_v1  ;;  %v3902_v3 = vunpack.i.l.bf16 %v3901_v1 }
 0x624   : > { %4109 = vpow2.f32 %v1058_v63  ;;  %v3503_v10 = vpack.c.bf16 %v3908_v6, %v3907_v7 }
 0x625   : > { %v3497_v4 = vpack.c.bf16 %v3903_v2, %v3902_v3  ;;  %v3916_v18 = vpop.permute.xlu1 %3915 }
 0x626   : > { %v3911_v8 = vpop.permute.xlu0 %3910  ;;  %v3918_v19 = vunpack.i.h.bf16 %v3916_v18  ;;  %v3917_v20 = vunpack.i.l.bf16 %v3916_v18 }
 0x627   : > { %3499 = vmatprep.subr.msk.bf16.mxu1 %vm4364_vm3, %v3497_v4  ;;  %v3913_v13 = vunpack.i.h.bf16 %v3911_v8  ;;  %v3912_v15 = vunpack.i.l.bf16 %v3911_v8 }
 0x628   : > { %v3515_v21 = vpack.c.bf16 %v3918_v19, %v3917_v20 }
 0x629   : > { %v3509_v16 = vpack.c.bf16 %v3913_v13, %v3912_v15  ;;  %v1201_v22 = vpop.permute.xlu1 %1200 }
 0x62a   : > { %v1199_v11 = vpop.permute.xlu0 %1198 }
 0x62d   : > { %v4487_v9 = vpop.eup %4107  ;;  %v3926_v26 = vpop.permute.xlu1 %3925 }
 0x62e   : > { %v4489_v12 = vpop.eup %4109  ;;  %3165 = vmatprep.mubr.msk.f32.mxu1 %vm510_vm4, %v4487_v9  ;;  %v3921_v24 = vpop.permute.xlu0 %3920  ;;  %v3928_v31 = vunpack.i.h.bf16 %v3926_v26  ;;  %v3927_v35 = vunpack.i.l.bf16 %v3926_v26 }
 0x62f   : > { %3166 = vmatmul.mubr.msk.f32.vlgmr.msra.gmra.mrb[4].mxu1 %vm510_vm4, %v4489_v12  ;;  %v3923_v28 = vunpack.i.h.bf16 %v3921_v24  ;;  %v3922_v30 = vunpack.i.l.bf16 %v3921_v24 }
 0x630   : > { %3502 = vmatpush3.bf16.xpose.msk.msra.mxu1 %vm4364_vm3, %v3497_v4  ;;  %3184 = vmatprep.mubr.msk.f32.mxu1 %vm412_vm2, %v1199_v11  ;;  %v3525_v37 = vpack.c.bf16 %v3928_v31, %v3927_v35 }
 0x631   : > { %3505 = vmatprep.subr.msk.bf16.mxu1 %vm4364_vm3, %v3503_v10  ;;  %v3521_v36 = vpack.c.bf16 %v3923_v28, %v3922_v30  ;;  %v3936_v40 = vpop.permute.xlu1 %3935 }
 0x632   : > { %v3931_v39 = vpop.permute.xlu0 %3930  ;;  %v3938_v44 = vunpack.i.h.bf16 %v3936_v40  ;;  %v3937_v45 = vunpack.i.l.bf16 %v3936_v40 }
 0x633   : > { %3522 = vmatprep.subr.bf16.mxu0 %v3521_v36  ;;  %v3933_v41 = vunpack.i.h.bf16 %v3931_v39  ;;  %v3932_v42 = vunpack.i.l.bf16 %v3931_v39 }
 0x634   : > { %3524 = vmatpush3.bf16.msra.mxu0 %v3521_v36  ;;  %v3533_v46 = vpack.c.bf16 %v3938_v44, %v3937_v45 }
 0x635   : > { %v3529_v43 = vpack.c.bf16 %v3933_v41, %v3932_v42  ;;  %3526 = vmatprep.subr.bf16.mxu0 %v3525_v37 }
 0x638   : > { %3508 = vmatpush3.bf16.xpose.msk.msra.mxu1 %vm4364_vm3, %v3503_v10  ;;  %3528 = vmatpush3.bf16.msra.mxu0 %v3525_v37 }
 0x639   : > { %3511 = vmatprep.subr.msk.bf16.mxu1 %vm4364_vm3, %v3509_v16  ;;  %3530 = vmatprep.subr.bf16.mxu0 %v3529_v43 }
 0x63c   : > { %3532 = vmatpush3.bf16.msra.mxu0 %v3529_v43 }
 0x63d   : > { %3534 = vmatprep.subr.bf16.mxu0 %v3533_v46 }
 0x640   : > { %3514 = vmatpush3.bf16.xpose.msk.msra.mxu1 %vm4364_vm3, %v3509_v16  ;;  %3536 = vmatpush3.bf16.msra.mxu0 %v3533_v46 }
 0x641   : > { %3517 = vmatprep.subr.msk.bf16.mxu1 %vm4364_vm3, %v3515_v21 }
 0x648   : > { %3520 = vmatpush3.bf16.xpose.msk.msra.mxu1 %vm4364_vm3, %v3515_v21 }
 0x64f   : > { %3185 = vmatmul.mubr.msk.f32.vlgmr.msra.gmra.mrb[6].mxu1 %vm412_vm2, %v1201_v22 }
 0x702   : > { %v4511_v47 = vpop.f32.mrb[4].mxu1 }
 0x703   : > { %v4513_v48 = vpop.f32.mrb[5].mxu1 }
 0x722   : > { %v3186_v49 = vpop.f32.mrb[6].mxu1 }
 0x723   : > { %v1312_v53 = vpop.f32.mrb[7].mxu1  ;;  %v1324_v54 = vsel %vm510_vm4, %v3186_v49, -inf }
 0x724   : > { %1325 = vmax.xlane.f32.xlu1 %v1324_v54  ;;  %v1321_v55 = vsel %vm510_vm4, %v1312_v53, -inf }
 0x725   : > { %1322 = vmax.xlane.f32.xlu0 %v1321_v55 }
 0x735   : > { %3945 = vrot.lane.b32.xlu1 %v4343_v32, %s4214_s8 }
 0x739   : > { %3955 = vrot.lane.b32.xlu1 %v4346_v33, %s4214_s8 }
 0x73b   : > { %3940 = vrot.lane.b32.xlu0 %v4338_v25, %s4214_s8 }
 0x73d   : > { %1473 = vrot.lane.b32.xlu1 %v4385_v52, %s4215_s9 }
 0x73f   : > { %3950 = vrot.lane.b32.xlu0 %v4340_v29, %s4214_s8 }
 0x741   : > { %3965 = vrot.lane.b32.xlu1 %v4343_v32, %s4216_s10 }
 0x743   : > { %1471 = vrot.lane.b32.xlu0 %v4354_v34, %s4215_s9 }
 0x745   : > { %3975 = vrot.lane.b32.xlu1 %v4346_v33, %s4216_s10 }
 0x747   : > { %3960 = vrot.lane.b32.xlu0 %v4338_v25, %s4216_s10 }
 0x74b   : > { %3970 = vrot.lane.b32.xlu0 %v4340_v29, %s4216_s10 }
 0x7b1   : > { %v1326_v56 = vpop.xlane.xlu1 %1325 }
 0x7b2   : > { %v1328_v57 = vsub.f32 %v3186_v49, %v1326_v56  ;;  %v1323_v60 = vpop.xlane.xlu0 %1322 }
 0x7b3   : > { %v1327_v61 = vsub.f32 %v1312_v53, %v1323_v60 }
 0x7b4   : > { %v1331_v62 = vmul.f32 1.442695, %v1328_v57 }
 0x7b5   : > { %v1329_v63 = vmul.f32 1.442695, %v1327_v61  ;;  %v3946_v4 = vpop.permute.xlu1 %3945 }
 0x7b6   : > { %v3941_v0 = vpop.permute.xlu0 %3940  ;;  %v3948_v5 = vunpack.i.h.bf16 %v3946_v4  ;;  %v3947_v6 = vunpack.i.l.bf16 %v3946_v4 }
 0x7b7   : > { %4111 = vpow2.f32 %v1329_v63  ;;  %v3943_v1 = vunpack.i.h.bf16 %v3941_v0  ;;  %v3942_v2 = vunpack.i.l.bf16 %v3941_v0 }
 0x7b8   : > { %4113 = vpow2.f32 %v1331_v62  ;;  %v3543_v10 = vpack.c.bf16 %v3948_v5, %v3947_v6 }
 0x7b9   : > { %v3537_v3 = vpack.c.bf16 %v3943_v1, %v3942_v2  ;;  %v3956_v19 = vpop.permute.xlu1 %3955 }
 0x7ba   : > { %v3951_v7 = vpop.permute.xlu0 %3950  ;;  %v3958_v20 = vunpack.i.h.bf16 %v3956_v19  ;;  %v3957_v21 = vunpack.i.l.bf16 %v3956_v19 }
 0x7bb   : > { %3539 = vmatprep.subr.msk.bf16.mxu0 %vm4364_vm3, %v3537_v3  ;;  %v3953_v15 = vunpack.i.h.bf16 %v3951_v7  ;;  %v3952_v16 = vunpack.i.l.bf16 %v3951_v7 }
 0x7bc   : > { %v3555_v22 = vpack.c.bf16 %v3958_v20, %v3957_v21 }
 0x7bd   : > { %v3549_v18 = vpack.c.bf16 %v3953_v15, %v3952_v16  ;;  %v1474_v24 = vpop.permute.xlu1 %1473 }
 0x7be   : > { %v1472_v11 = vpop.permute.xlu0 %1471 }
 0x7c1   : > { %v4529_v8 = vpop.eup %4111  ;;  %v3966_v28 = vpop.permute.xlu1 %3965 }
 0x7c2   : > { %v4531_v13 = vpop.eup %4113  ;;  %3203 = vmatprep.mubr.msk.f32.mxu0 %vm510_vm4, %v4529_v8  ;;  %v3961_v26 = vpop.permute.xlu0 %3960  ;;  %v3968_v35 = vunpack.i.h.bf16 %v3966_v28  ;;  %v3967_v36 = vunpack.i.l.bf16 %v3966_v28 }
 0x7c3   : > { %3204 = vmatmul.mubr.msk.f32.vlgmr.msra.gmra.mrb[6].mxu0 %vm510_vm4, %v4531_v13  ;;  %v3963_v30 = vunpack.i.h.bf16 %v3961_v26  ;;  %v3962_v31 = vunpack.i.l.bf16 %v3961_v26 }
 0x7c4   : > { %3542 = vmatpush3.bf16.xpose.msk.msra.mxu0 %vm4364_vm3, %v3537_v3  ;;  %3222 = vmatprep.mubr.msk.f32.mxu0 %vm412_vm2, %v1472_v11  ;;  %v3565_v39 = vpack.c.bf16 %v3968_v35, %v3967_v36 }
 0x7c5   : > { %3545 = vmatprep.subr.msk.bf16.mxu0 %vm4364_vm3, %v3543_v10  ;;  %v3561_v37 = vpack.c.bf16 %v3963_v30, %v3962_v31  ;;  %v3976_v41 = vpop.permute.xlu1 %3975 }
 0x7c6   : > { %v3971_v40 = vpop.permute.xlu0 %3970  ;;  %v3978_v45 = vunpack.i.h.bf16 %v3976_v41  ;;  %v3977_v46 = vunpack.i.l.bf16 %v3976_v41 }
 0x7c7   : > { %3562 = vmatprep.subr.bf16.mxu1 %v3561_v37  ;;  %v3973_v42 = vunpack.i.h.bf16 %v3971_v40  ;;  %v3972_v43 = vunpack.i.l.bf16 %v3971_v40 }
 0x7c8   : > { %3564 = vmatpush3.bf16.msra.mxu1 %v3561_v37  ;;  %v3573_v49 = vpack.c.bf16 %v3978_v45, %v3977_v46 }
 0x7c9   : > { %v3569_v44 = vpack.c.bf16 %v3973_v42, %v3972_v43  ;;  %3566 = vmatprep.subr.bf16.mxu1 %v3565_v39 }
 0x7cc   : > { %3548 = vmatpush3.bf16.xpose.msk.msra.mxu0 %vm4364_vm3, %v3543_v10  ;;  %3568 = vmatpush3.bf16.msra.mxu1 %v3565_v39 }
 0x7cd   : > { %3551 = vmatprep.subr.msk.bf16.mxu0 %vm4364_vm3, %v3549_v18  ;;  %3570 = vmatprep.subr.bf16.mxu1 %v3569_v44 }
 0x7d0   : > { %3572 = vmatpush3.bf16.msra.mxu1 %v3569_v44 }
 0x7d1   : > { %3574 = vmatprep.subr.bf16.mxu1 %v3573_v49 }
 0x7d4   : > { %3554 = vmatpush3.bf16.xpose.msk.msra.mxu0 %vm4364_vm3, %v3549_v18  ;;  %3576 = vmatpush3.bf16.msra.mxu1 %v3573_v49 }
 0x7d5   : > { %3557 = vmatprep.subr.msk.bf16.mxu0 %vm4364_vm3, %v3555_v22 }
 0x7dc   : > { %3560 = vmatpush3.bf16.xpose.msk.msra.mxu0 %vm4364_vm3, %v3555_v22 }
 0x7e3   : > { %3223 = vmatmul.mubr.msk.f32.vlgmr.msra.gmra.mrb[8].mxu0 %vm412_vm2, %v1474_v24 }
 0x896   : > { %v4553_v53 = vpop.f32.mrb[6].mxu0 }
 0x897   : > { %v4555_v54 = vpop.f32.mrb[7].mxu0 }
 0x8b6   : > { %v3224_v55 = vpop.f32.mrb[8].mxu0 }
 0x8b7   : > { %v1585_v56 = vpop.f32.mrb[9].mxu0  ;;  %v1597_v57 = vsel %vm510_vm4, %v3224_v55, -inf }
 0x8b8   : > { %1598 = vmax.xlane.f32.xlu1 %v1597_v57  ;;  %v1594_v60 = vsel %vm510_vm4, %v1585_v56, -inf }
 0x8b9   : > { %1595 = vmax.xlane.f32.xlu0 %v1594_v60 }
 0x8c9   : > { %3985 = vrot.lane.b32.xlu1 %v4343_v32, %s4217_s11 }
 0x8cd   : > { %3995 = vrot.lane.b32.xlu1 %v4346_v33, %s4217_s11 }
 0x8cf   : > { %3980 = vrot.lane.b32.xlu0 %v4338_v25, %s4217_s11 }
 0x8d1   : > { %1746 = vrot.lane.b32.xlu1 %v4385_v52, %s4218_s12 }
 0x8d3   : > { %3990 = vrot.lane.b32.xlu0 %v4340_v29, %s4217_s11 }
 0x8d5   : > { %4005 = vrot.lane.b32.xlu1 %v4343_v32, %s4219_s13 }
 0x8d7   : > { %1744 = vrot.lane.b32.xlu0 %v4354_v34, %s4218_s12 }
 0x8d9   : > { %4015 = vrot.lane.b32.xlu1 %v4346_v33, %s4219_s13 }
 0x8db   : > { %4000 = vrot.lane.b32.xlu0 %v4338_v25, %s4219_s13 }
 0x8df   : > { %4010 = vrot.lane.b32.xlu0 %v4340_v29, %s4219_s13 }
 0x945   : > { %v1599_v61 = vpop.xlane.xlu1 %1598 }
 0x946   : > { %v1601_v62 = vsub.f32 %v3224_v55, %v1599_v61  ;;  %v1596_v63 = vpop.xlane.xlu0 %1595 }
 0x947   : > { %v1600_v0 = vsub.f32 %v1585_v56, %v1596_v63  ;;  %v2010_v63 = vld [vmem:[#allocation2 + $0x18] sm:$0xff] }
 0x948   : > { %v1604_v1 = vmul.f32 1.442695, %v1601_v62  ;;  %v2009_v62 = vld [vmem:[#allocation2 + $0x10] sm:$0xff] }
 0x949   : > { %v1602_v2 = vmul.f32 1.442695, %v1600_v0  ;;  %v3986_v5 = vpop.permute.xlu1 %3985  ;;  %v4601_v0 = vpack.i.bf16 %v2010_v63, %v2009_v62 }
 0x94a   : > { %v3981_v52 = vpop.permute.xlu0 %3980  ;;  %v3988_v25 = vunpack.i.h.bf16 %v3986_v5  ;;  %v3987_v29 = vunpack.i.l.bf16 %v3986_v5  ;;  %v2011_v5 = vld [vmem:[#allocation2 + $0x20] sm:$0xff] }
 0x94b   : > { %4115 = vpow2.f32 %v1602_v2  ;;  %v3983_v3 = vunpack.i.h.bf16 %v3981_v52  ;;  %v3982_v4 = vunpack.i.l.bf16 %v3981_v52  ;;  %v2014_v2 = vld [vmem:[#allocation2 + $0x38] sm:$0xff]  ;;  %v2007_v52 = vld [vmem:[#allocation2] sm:$0xff] }
 0x94c   : > { %4117 = vpow2.f32 %v1604_v1  ;;  %v3583_v6 = vpack.c.bf16 %v3988_v25, %v3987_v29  ;;  %v2013_v1 = vld [vmem:[#allocation2 + $0x30] sm:$0xff]  ;;  %v2012_v25 = vld [vmem:[#allocation2 + $0x28] sm:$0xff] }
 0x94d   : > { %v3577_v34 = vpack.c.bf16 %v3983_v3, %v3982_v4  ;;  %v3996_v18 = vpop.permute.xlu1 %3995  ;;  %v2008_v3 = vld [vmem:[#allocation2 + $0x8] sm:$0xff]  ;;  %v4604_v4 = vpack.i.bf16 %v2014_v2, %v2013_v1 }
 0x94e   : > { %v3991_v32 = vpop.permute.xlu0 %3990  ;;  %v3998_v19 = vunpack.i.h.bf16 %v3996_v18  ;;  %v3997_v20 = vunpack.i.l.bf16 %v3996_v18  ;;  %v4610_v29 = vld [vmem:[%s4351_s23 + $0x8] sm:$0xff] }
 0x94f   : > { %3579 = vmatprep.subr.msk.bf16.mxu1 %vm4364_vm3, %v3577_v34  ;;  %v3993_v11 = vunpack.i.h.bf16 %v3991_v32  ;;  %v3992_v15 = vunpack.i.l.bf16 %v3991_v32  ;;  %v4613_v32 = vpack.i.bf16 %v2012_v25, %v2011_v5 }
 0x950   : > { %v3595_v21 = vpack.c.bf16 %v3998_v19, %v3997_v20 }
 0x951   : > { %v3589_v16 = vpack.c.bf16 %v3993_v11, %v3992_v15  ;;  %v1747_v22 = vpop.permute.xlu1 %1746 }
 0x952   : > { %v1745_v7 = vpop.permute.xlu0 %1744 }
 0x955   : > { %v4571_v33 = vpop.eup %4115  ;;  %v4006_v26 = vpop.permute.xlu1 %4005 }
 0x956   : > { %v4573_v10 = vpop.eup %4117  ;;  %3241 = vmatprep.mubr.msk.f32.mxu1 %vm510_vm4, %v4571_v33  ;;  %v4001_v24 = vpop.permute.xlu0 %4000  ;;  %v4008_v31 = vunpack.i.h.bf16 %v4006_v26  ;;  %v4007_v35 = vunpack.i.l.bf16 %v4006_v26 }
 0x957   : > { %3242 = vmatmul.mubr.msk.f32.vlgmr.msra.gmra.mrb[8].mxu1 %vm510_vm4, %v4573_v10  ;;  %v4003_v28 = vunpack.i.h.bf16 %v4001_v24  ;;  %v4002_v30 = vunpack.i.l.bf16 %v4001_v24 }
 0x958   : > { %3582 = vmatpush3.bf16.xpose.msk.msra.mxu1 %vm4364_vm3, %v3577_v34  ;;  %3260 = vmatprep.mubr.msk.f32.mxu1 %vm412_vm2, %v1745_v7  ;;  %v3605_v37 = vpack.c.bf16 %v4008_v31, %v4007_v35  ;;  %v4606_v34 = vpack.i.bf16 %v2008_v3, %v2007_v52 }
 0x959   : > { %3585 = vmatprep.subr.msk.bf16.mxu1 %vm4364_vm3, %v3583_v6  ;;  %v3601_v36 = vpack.c.bf16 %v4003_v28, %v4002_v30  ;;  %v4016_v40 = vpop.permute.xlu1 %4015 }
 0x95a   : > { %v4011_v39 = vpop.permute.xlu0 %4010  ;;  %v4018_v44 = vunpack.i.h.bf16 %v4016_v40  ;;  %v4017_v45 = vunpack.i.l.bf16 %v4016_v40 }
 0x95b   : > { %3602 = vmatprep.subr.bf16.mxu0 %v3601_v36  ;;  %v4013_v41 = vunpack.i.h.bf16 %v4011_v39  ;;  %v4012_v42 = vunpack.i.l.bf16 %v4011_v39 }
 0x95c   : > { %3604 = vmatpush3.bf16.msra.mxu0 %v3601_v36  ;;  %v3613_v46 = vpack.c.bf16 %v4018_v44, %v4017_v45 }
 0x95d   : > { %v3609_v43 = vpack.c.bf16 %v4013_v41, %v4012_v42  ;;  %3606 = vmatprep.subr.bf16.mxu0 %v3605_v37 }
 0x960   : > { %3588 = vmatpush3.bf16.xpose.msk.msra.mxu1 %vm4364_vm3, %v3583_v6  ;;  %3608 = vmatpush3.bf16.msra.mxu0 %v3605_v37  ;;  %v4618_v6 = vld [vmem:[%s4351_s23] sm:$0xff]  ;;  %s4223_s23 = smov 68  }
 0x961   : > { %3591 = vmatprep.subr.msk.bf16.mxu1 %vm4364_vm3, %v3589_v16  ;;  %3610 = vmatprep.subr.bf16.mxu0 %v3609_v43 }
 0x964   : > { %3612 = vmatpush3.bf16.msra.mxu0 %v3609_v43 }
 0x965   : > { %3614 = vmatprep.subr.bf16.mxu0 %v3613_v46 }
 0x968   : > { %3594 = vmatpush3.bf16.xpose.msk.msra.mxu1 %vm4364_vm3, %v3589_v16  ;;  %3616 = vmatpush3.bf16.msra.mxu0 %v3613_v46 }
 0x969   : > { %3597 = vmatprep.subr.msk.bf16.mxu1 %vm4364_vm3, %v3595_v21 }
 0x970   : > { %3600 = vmatpush3.bf16.xpose.msk.msra.mxu1 %vm4364_vm3, %v3595_v21 }
 0x977   : > { %3261 = vmatmul.mubr.msk.f32.vlgmr.msra.gmra.mrb[10].mxu1 %vm412_vm2, %v1747_v22 }
 0xa2a   : > { %v4595_v49 = vpop.f32.mrb[8].mxu1 }
 0xa2b   : > { %v4597_v55 = vpop.f32.mrb[9].mxu1 }
 0xa4a   : > { %v3262_v56 = vpop.f32.mrb[10].mxu1 }
 0xa4b   : > { %v1858_v57 = vpop.f32.mrb[11].mxu1  ;;  %v1870_v60 = vsel %vm510_vm4, %v3262_v56, -inf }
 0xa4c   : > { %1871 = vmax.xlane.f32.xlu1 %v1870_v60  ;;  %v1867_v61 = vsel %vm510_vm4, %v1858_v57, -inf }
 0xa4d   : > { %1868 = vmax.xlane.f32.xlu0 %v1867_v61 }
 0xa5d   : > { %4025 = vrot.lane.b32.xlu1 %v4601_v0, %s4220_s14 }
 0xa61   : > { %4035 = vrot.lane.b32.xlu1 %v4604_v4, %s4220_s14 }
 0xa63   : > { %4020 = vrot.lane.b32.xlu0 %v4606_v34, %s4220_s14 }
 0xa65   : > { %2019 = vrot.lane.b32.xlu1 %v4610_v29, %s4221_s16 }
 0xa67   : > { %4030 = vrot.lane.b32.xlu0 %v4613_v32, %s4220_s14  ;;  %s4232_s14 = smov 28  }
 0xa69   : > { %4045 = vrot.lane.b32.xlu1 %v4601_v0, %s4222_s22 }
 0xa6b   : > { %2017 = vrot.lane.b32.xlu0 %v4618_v6, %s4221_s16 }
 0xa6d   : > { %4055 = vrot.lane.b32.xlu1 %v4604_v4, %s4222_s22 }
 0xa6f   : > { %4040 = vrot.lane.b32.xlu0 %v4606_v34, %s4222_s22 }
 0xa73   : > { %4050 = vrot.lane.b32.xlu0 %v4613_v32, %s4222_s22 }
 0xad9   : > { %v1872_v7 = vpop.xlane.xlu1 %1871 }
 0xada   : > { %v1874_v11 = vsub.f32 %v3262_v56, %v1872_v7  ;;  %v1869_v15 = vpop.xlane.xlu0 %1868 }
 0xadb   : > { %v1873_v16 = vsub.f32 %v1858_v57, %v1869_v15 }
 0xadc   : > { %v1877_v18 = vmul.f32 1.442695, %v1874_v11 }
 0xadd   : > { %v1875_v19 = vmul.f32 1.442695, %v1873_v16  ;;  %v4026_v26 = vpop.permute.xlu1 %4025 }
 0xade   : > { %v4021_v20 = vpop.permute.xlu0 %4020  ;;  %v4028_v28 = vunpack.i.h.bf16 %v4026_v26  ;;  %v4027_v30 = vunpack.i.l.bf16 %v4026_v26 }
 0xadf   : > { %4119 = vpow2.f32 %v1875_v19  ;;  %v4023_v21 = vunpack.i.h.bf16 %v4021_v20  ;;  %v4022_v22 = vunpack.i.l.bf16 %v4021_v20 }
 0xae0   : > { %4121 = vpow2.f32 %v1877_v18  ;;  %v3623_v36 = vpack.c.bf16 %v4028_v28, %v4027_v30 }
 0xae1   : > { %v3617_v24 = vpack.c.bf16 %v4023_v21, %v4022_v22  ;;  %v4036_v43 = vpop.permute.xlu1 %4035 }
 0xae2   : > { %v4031_v31 = vpop.permute.xlu0 %4030  ;;  %v4038_v44 = vunpack.i.h.bf16 %v4036_v43  ;;  %v4037_v45 = vunpack.i.l.bf16 %v4036_v43 }
 0xae3   : > { %3619 = vmatprep.subr.msk.bf16.mxu0 %vm4364_vm3, %v3617_v24  ;;  %v4033_v40 = vunpack.i.h.bf16 %v4031_v31  ;;  %v4032_v41 = vunpack.i.l.bf16 %v4031_v31 }
 0xae4   : > { %v3635_v46 = vpack.c.bf16 %v4038_v44, %v4037_v45 }
 0xae5   : > { %v3629_v42 = vpack.c.bf16 %v4033_v40, %v4032_v41  ;;  %v2020_v56 = vpop.permute.xlu1 %2019 }
 0xae6   : > { %v2018_v37 = vpop.permute.xlu0 %2017 }
 0xae9   : > { %v4627_v35 = vpop.eup %4119  ;;  %v4046_v60 = vpop.permute.xlu1 %4045 }
 0xaea   : > { %v4629_v39 = vpop.eup %4121  ;;  %3279 = vmatprep.mubr.msk.f32.mxu0 %vm510_vm4, %v4627_v35  ;;  %v4041_v57 = vpop.permute.xlu0 %4040  ;;  %v4048_v63 = vunpack.i.h.bf16 %v4046_v60  ;;  %v4047_v1 = vunpack.i.l.bf16 %v4046_v60 }
 0xaeb   : > { %3280 = vmatmul.mubr.msk.f32.vlgmr.msra.gmra.mrb[10].mxu0 %vm510_vm4, %v4629_v39  ;;  %v4043_v61 = vunpack.i.h.bf16 %v4041_v57  ;;  %v4042_v62 = vunpack.i.l.bf16 %v4041_v57 }
 0xaec   : > { %3622 = vmatpush3.bf16.xpose.msk.msra.mxu0 %vm4364_vm3, %v3617_v24  ;;  %3298 = vmatprep.mubr.msk.f32.mxu0 %vm412_vm2, %v2018_v37  ;;  %v3645_v52 = vpack.c.bf16 %v4048_v63, %v4047_v1 }
 0xaed   : > { %3625 = vmatprep.subr.msk.bf16.mxu0 %vm4364_vm3, %v3623_v36  ;;  %v3641_v2 = vpack.c.bf16 %v4043_v61, %v4042_v62  ;;  %v4056_v5 = vpop.permute.xlu1 %4055 }
 0xaee   : > { %v4051_v3 = vpop.permute.xlu0 %4050  ;;  %v4058_v15 = vunpack.i.h.bf16 %v4056_v5  ;;  %v4057_v16 = vunpack.i.l.bf16 %v4056_v5 }
 0xaef   : > { %3642 = vmatprep.subr.bf16.mxu1 %v3641_v2  ;;  %v4053_v25 = vunpack.i.h.bf16 %v4051_v3  ;;  %v4052_v7 = vunpack.i.l.bf16 %v4051_v3 }
 0xaf0   : > { %3644 = vmatpush3.bf16.msra.mxu1 %v3641_v2  ;;  %v3653_v18 = vpack.c.bf16 %v4058_v15, %v4057_v16 }
 0xaf1   : > { %v3649_v11 = vpack.c.bf16 %v4053_v25, %v4052_v7  ;;  %3646 = vmatprep.subr.bf16.mxu1 %v3645_v52 }
 0xaf4   : > { %3628 = vmatpush3.bf16.xpose.msk.msra.mxu0 %vm4364_vm3, %v3623_v36  ;;  %3648 = vmatpush3.bf16.msra.mxu1 %v3645_v52 }
 0xaf5   : > { %3631 = vmatprep.subr.msk.bf16.mxu0 %vm4364_vm3, %v3629_v42  ;;  %3650 = vmatprep.subr.bf16.mxu1 %v3649_v11 }
 0xaf8   : > { %3652 = vmatpush3.bf16.msra.mxu1 %v3649_v11 }
 0xaf9   : > { %3654 = vmatprep.subr.bf16.mxu1 %v3653_v18 }
 0xafc   : > { %3634 = vmatpush3.bf16.xpose.msk.msra.mxu0 %vm4364_vm3, %v3629_v42  ;;  %3656 = vmatpush3.bf16.msra.mxu1 %v3653_v18 }
 0xafd   : > { %3637 = vmatprep.subr.msk.bf16.mxu0 %vm4364_vm3, %v3635_v46 }
 0xb04   : > { %3640 = vmatpush3.bf16.xpose.msk.msra.mxu0 %vm4364_vm3, %v3635_v46 }
 0xb0b   : > { %3299 = vmatmul.mubr.msk.f32.vlgmr.msra.gmra.mrb[12].mxu0 %vm412_vm2, %v2020_v56 }
 0xbbe   : > { %v4651_v19 = vpop.f32.mrb[10].mxu0 }
 0xbbf   : > { %v4653_v20 = vpop.f32.mrb[11].mxu0 }
 0xbde   : > { %v3300_v21 = vpop.f32.mrb[12].mxu0 }
 0xbdf   : > { %v2131_v22 = vpop.f32.mrb[13].mxu0  ;;  %v2143_v24 = vsel %vm510_vm4, %v3300_v21, -inf }
 0xbe0   : > { %2144 = vmax.xlane.f32.xlu1 %v2143_v24  ;;  %v2140_v26 = vsel %vm510_vm4, %v2131_v22, -inf }
 0xbe1   : > { %2141 = vmax.xlane.f32.xlu0 %v2140_v26 }
 0xbf1   : > { %4065 = vrot.lane.b32.xlu1 %v4601_v0, %s4223_s23 }
 0xbf5   : > { %4075 = vrot.lane.b32.xlu1 %v4604_v4, %s4223_s23 }
 0xbf7   : > { %4060 = vrot.lane.b32.xlu0 %v4606_v34, %s4223_s23 }
 0xbf9   : > { %2292 = vrot.lane.b32.xlu1 %v4610_v29, %s4224_s24 }
 0xbfb   : > { %4070 = vrot.lane.b32.xlu0 %v4613_v32, %s4223_s23 }
 0xbfd   : > { %4085 = vrot.lane.b32.xlu1 %v4601_v0, %s4225_s15 }
 0xbff   : > { %2290 = vrot.lane.b32.xlu0 %v4618_v6, %s4224_s24 }
 0xc03   : > { %4080 = vrot.lane.b32.xlu0 %v4606_v34, %s4225_s15 }
 0xc6d   : > { %v2145_v28 = vpop.xlane.xlu1 %2144 }
 0xc6e   : > { %v2147_v30 = vsub.f32 %v3300_v21, %v2145_v28  ;;  %v2142_v31 = vpop.xlane.xlu0 %2141 }
 0xc6f   : > { %v2146_v36 = vsub.f32 %v2131_v22, %v2142_v31  ;;  %v790_v31 = vsel %vm510_vm4, %v4447_v17, 0.0  ;;  %v1063_v17 = vsel %vm510_vm4, %v4489_v12, 0.0 }
 0xc70   : > { %v2150_v37 = vmul.f32 1.442695, %v2147_v30 }
 0xc71   : > { %v2148_v40 = vmul.f32 1.442695, %v2146_v36  ;;  %v4066_v6 = vpop.permute.xlu1 %4065  ;;  %v787_v36 = vsel %vm510_vm4, %v4445_v14, 0.0  ;;  %v1879_v14 = vsel %vm510_vm4, %v4627_v35, 0.0 }
 0xc72   : > { %v4061_v41 = vpop.permute.xlu0 %4060  ;;  %v4068_v34 = vunpack.i.h.bf16 %v4066_v6  ;;  %v4067_v44 = vunpack.i.l.bf16 %v4066_v6 }
 0xc73   : > { %4123 = vpow2.f32 %v2148_v40  ;;  %v4063_v29 = vunpack.i.h.bf16 %v4061_v41  ;;  %v4062_v42 = vunpack.i.l.bf16 %v4061_v41  ;;  %v1060_v40 = vsel %vm510_vm4, %v4487_v9, 0.0 }
 0xc74   : > { %4125 = vpow2.f32 %v2150_v37  ;;  %v3663_v46 = vpack.c.bf16 %v4068_v34, %v4067_v44  ;;  %v1333_v37 = vsel %vm510_vm4, %v4529_v8, 0.0  ;;  %v1336_v8 = vsel %vm510_vm4, %v4531_v13, 0.0 }
 0xc75   : > { %v3657_v43 = vpack.c.bf16 %v4063_v29, %v4062_v42  ;;  %v4076_v63 = vpop.permute.xlu1 %4075  ;;  %v1609_v9 = vsel %vm510_vm4, %v4573_v10, 0.0 }
 0xc76   : > { %v4071_v45 = vpop.permute.xlu0 %4070  ;;  %v4078_v1 = vunpack.i.h.bf16 %v4076_v63  ;;  %v4077_v2 = vunpack.i.l.bf16 %v4076_v63  ;;  %v523_v63 = vsel %vm510_vm4, %v4403_v23, 0.0 }
 0xc77   : > { %3659 = vmatprep.subr.msk.bf16.mxu1 %vm4364_vm3, %v3657_v43  ;;  %v4073_v60 = vunpack.i.h.bf16 %v4071_v45  ;;  %v4072_v61 = vunpack.i.l.bf16 %v4071_v45 }
 0xc78   : > { %v3675_v52 = vpack.c.bf16 %v4078_v1, %v4077_v2 }
 0xc79   : > { %v3669_v62 = vpack.c.bf16 %v4073_v60, %v4072_v61  ;;  %v2293_v3 = vpop.permute.xlu1 %2292 }
 0xc7a   : > { %v2291_v56 = vpop.permute.xlu0 %2290 }
 0xc7d   : > { %v4124_v0 = vpop.eup %4123  ;;  %v4086_v15 = vpop.permute.xlu1 %4085 }
 0xc7e   : > { %v4669_v57 = vpop.eup %4125  ;;  %3317 = vmatprep.mubr.msk.f32.mxu1 %vm510_vm4, %v4124_v0  ;;  %v4081_v5 = vpop.permute.xlu0 %4080  ;;  %v4088_v16 = vunpack.i.h.bf16 %v4086_v15  ;;  %v4087_v18 = vunpack.i.l.bf16 %v4086_v15 }
 0xc7f   : > { %3318 = vmatmul.mubr.msk.f32.vlgmr.msra.gmra.mrb[12].mxu1 %vm510_vm4, %v4669_v57  ;;  %v4083_v25 = vunpack.i.h.bf16 %v4081_v5  ;;  %v4082_v7 = vunpack.i.l.bf16 %v4081_v5  ;;  %v2155_v12 = vsel %vm510_vm4, %v4669_v57, 0.0 }
 0xc80   : > { %3662 = vmatpush3.bf16.xpose.msk.msra.mxu1 %vm4364_vm3, %v3657_v43  ;;  %3336 = vmatprep.mubr.msk.f32.mxu1 %vm412_vm2, %v2291_v56  ;;  %v3685_v21 = vpack.c.bf16 %v4088_v16, %v4087_v18 }
 0xc81   : > { %3665 = vmatprep.subr.msk.bf16.mxu1 %vm4364_vm3, %v3663_v46  ;;  %v3681_v11 = vpack.c.bf16 %v4083_v25, %v4082_v7 }
 0xc83   : > { %3682 = vmatprep.subr.bf16.mxu0 %v3681_v11 }
 0xc84   : > { %3684 = vmatpush3.bf16.msra.mxu0 %v3681_v11 }
 0xc85   : > { %3686 = vmatprep.subr.bf16.mxu0 %v3685_v21 }
 0xc88   : > { %3668 = vmatpush3.bf16.xpose.msk.msra.mxu1 %vm4364_vm3, %v3663_v46  ;;  %3688 = vmatpush3.bf16.msra.mxu0 %v3685_v21 }
 0xc89   : > { %3671 = vmatprep.subr.msk.bf16.mxu1 %vm4364_vm3, %v3669_v62 }
 0xc90   : > { %3674 = vmatpush3.bf16.xpose.msk.msra.mxu1 %vm4364_vm3, %v3669_v62  ;;  %v526_v62 = vsel %vm510_vm4, %v4405_v27, 0.0 }
 0xc91   : > { %3677 = vmatprep.subr.msk.bf16.mxu1 %vm4364_vm3, %v3675_v52 }
 0xc98   : > { %3680 = vmatpush3.bf16.xpose.msk.msra.mxu1 %vm4364_vm3, %v3675_v52 }
 0xc9f   : > { %3337 = vmatmul.mubr.msk.f32.vlgmr.msra.gmra.mrb[14].mxu1 %vm412_vm2, %v2293_v3 }
 0xd52   : > { %v4690_v22 = vpop.f32.mrb[12].mxu1 }
 0xd53   : > { %v4692_v24 = vpop.f32.mrb[13].mxu1 }
 0xd72   : > { %v3338_v38 = vpop.f32.mrb[14].mxu1 }
 0xd73   : > { %v2404_v26 = vpop.f32.mrb[15].mxu1  ;;  %v2416_v28 = vsel %vm510_vm4, %v3338_v38, -inf }
 0xd74   : > { %2417 = vmax.xlane.f32.xlu1 %v2416_v28  ;;  %v2413_v30 = vsel %vm510_vm4, %v2404_v26, -inf }
 0xd75   : > { %2414 = vmax.xlane.f32.xlu0 %v2413_v30 }
 0xd85   : > { %4095 = vrot.lane.b32.xlu1 %v4604_v4, %s4225_s15  ;;  %v1606_v4 = vsel %vm510_vm4, %v4571_v33, 0.0  ;;  %v1882_v33 = vsel %vm510_vm4, %v4629_v39, 0.0 }
 0xd8b   : > { %4090 = vrot.lane.b32.xlu0 %v4613_v32, %s4225_s15  ;;  %v2152_v32 = vsel %vm510_vm4, %v4124_v0, 0.0 }
 0xda9   : > { %791 = vadd.xlane.f32.xlu1 %v790_v31 }
 0xdaa   : > { %788 = vadd.xlane.f32.xlu0 %v787_v36 }
 0xdad   : > { %1334 = vadd.xlane.f32.xlu1 %v1333_v37 }
 0xdae   : > { %1061 = vadd.xlane.f32.xlu0 %v1060_v40 }
 0xdb1   : > { %1607 = vadd.xlane.f32.xlu1 %v1606_v4 }
 0xdb2   : > { %1064 = vadd.xlane.f32.xlu0 %v1063_v17 }
 0xdb5   : > { %1880 = vadd.xlane.f32.xlu1 %v1879_v14 }
 0xdb6   : > { %1337 = vadd.xlane.f32.xlu0 %v1336_v8 }
 0xdb9   : > { %2153 = vadd.xlane.f32.xlu1 %v2152_v32 }
 0xdba   : > { %1610 = vadd.xlane.f32.xlu0 %v1609_v9 }
 0xdbe   : > { %1883 = vadd.xlane.f32.xlu0 %v1882_v33 }
 0xdc2   : > { %2156 = vadd.xlane.f32.xlu0 %v2155_v12 }
 0xe01   : > { %v2418_v35 = vpop.xlane.xlu1 %2417 }
 0xe02   : > { %v2420_v41 = vsub.f32 %v3338_v38, %v2418_v35  ;;  %v2415_v29 = vpop.xlane.xlu0 %2414 }
 0xe03   : > { %v2419_v13 = vsub.f32 %v2404_v26, %v2415_v29 }
 0xe04   : > { %v2423_v42 = vmul.f32 1.442695, %v2420_v41 }
 0xe05   : > { %v2421_v43 = vmul.f32 1.442695, %v2419_v13  ;;  %v4096_v6 = vpop.permute.xlu1 %4095 }
 0xe06   : > { %4127 = vpow2.f32 %v2423_v42  ;;  %v4091_v34 = vpop.permute.xlu0 %4090  ;;  %v4098_v44 = vunpack.i.h.bf16 %v4096_v6  ;;  %v4097_v10 = vunpack.i.l.bf16 %v4096_v6 }
 0xe07   : > { %4129 = vpow2.f32 %v2421_v43  ;;  %v4093_v45 = vunpack.i.h.bf16 %v4091_v34  ;;  %v4092_v0 = vunpack.i.l.bf16 %v4091_v34 }
 0xe08   : > { %v3693_v46 = vpack.c.bf16 %v4098_v44, %v4097_v10 }
 0xe09   : > { %v3689_v39 = vpack.c.bf16 %v4093_v45, %v4092_v0 }
 0xe0b   : > { %3690 = vmatprep.subr.bf16.mxu0 %v3689_v39 }
 0xe0c   : > { %3692 = vmatpush3.bf16.msra.mxu0 %v3689_v39  ;;  %v2553_v39 = vld [vmem:[%s4781_s2] sm:$0xff] }
 0xe0d   : > { %3694 = vmatprep.subr.bf16.mxu0 %v3693_v46 }
 0xe10   : > { %v4128_v56 = vpop.eup %4127  ;;  %3696 = vmatpush3.bf16.msra.mxu0 %v3693_v46  ;;  %v2554_v46 = vld [vmem:[%s4781_s2 + $0x8] sm:$0xff] }
 0xe11   : > { %v4130_v57 = vpop.eup %4129  ;;  %v2428_v60 = vsel %vm510_vm4, %v4128_v56, 0.0 }
 0xe12   : > { %2429 = vadd.xlane.f32.xlu0 %v2428_v60  ;;  %3355 = vmatprep.mubr.msk.f32.mxu0 %vm510_vm4, %v4130_v57  ;;  %v2425_v61 = vsel %vm510_vm4, %v4130_v57, 0.0  ;;  %v2555_v57 = vld [vmem:[%s4781_s2 + $0x10] sm:$0xff]  ;;  %v2556_v60 = vld [vmem:[%s4781_s2 + $0x18] sm:$0xff] }
 0xe13   : > { %2426 = vadd.xlane.f32.xlu1 %v2425_v61  ;;  %3356 = vmatmul.mubr.msk.f32.vlgmr.msra.gmra.mrb[14].mxu0 %vm510_vm4, %v4128_v56  ;;  %v3697_v56 = vpack.c.bf16 %v2554_v46, %v2553_v39  ;;  %v3701_v61 = vpack.c.bf16 %v2556_v60, %v2555_v57 }
 0xe15   : > { %3698 = vmatprep.subr.bf16.mxu0 %v3697_v56 }
 0xe16   : > { %527 = vadd.xlane.f32.xlu0 %v526_v62  ;;  %3700 = vmatpush3.bf16.msra.mxu0 %v3697_v56 }
 0xe17   : > { %524 = vadd.xlane.f32.xlu1 %v523_v63  ;;  %3702 = vmatprep.subr.bf16.mxu0 %v3701_v61 }
 0xe1a   : > { %3704 = vmatpush3.bf16.msra.mxu0 %v3701_v61 }
 0xe36   : > { %v792_v1 = vpop.xlane.xlu1 %791 }
 0xe37   : > { %4131 = vrcp.f32 %v792_v1  ;;  %v789_v2 = vpop.xlane.xlu0 %788 }
 0xe38   : > { %4133 = vrcp.f32 %v789_v2 }
 0xe3a   : > { %v1335_v52 = vpop.xlane.xlu1 %1334 }
 0xe3b   : > { %4135 = vrcp.f32 %v1335_v52  ;;  %v1062_v3 = vpop.xlane.xlu0 %1061 }
 0xe3c   : > { %4137 = vrcp.f32 %v1062_v3 }
 0xe3e   : > { %v1608_v5 = vpop.xlane.xlu1 %1607 }
 0xe3f   : > { %4139 = vrcp.f32 %v1608_v5  ;;  %v1065_v25 = vpop.xlane.xlu0 %1064 }
 0xe40   : > { %4141 = vrcp.f32 %v1065_v25 }
 0xe41   : > { %v4132_v7 = vpop.eup %4131 }
 0xe42   : > { %v4134_v11 = vpop.eup %4133  ;;  %v1881_v27 = vpop.xlane.xlu1 %1880  ;;  %v901_v15 = vmul.f32 %v4132_v7, %v4469_v50 }
 0xe43   : > { %4143 = vrcp.f32 %v1881_v27  ;;  %v1338_v23 = vpop.xlane.xlu0 %1337  ;;  %v900_v16 = vmul.f32 %v4134_v11, %v4471_v51  ;;  %v2850_v27 = vld [vmem:[%s4782_s3] ss:$0 sm:$0xff] }
 0xe44   : > { %4145 = vrcp.f32 %v1338_v23  ;;  %906 = vrot.lane.b32.xlu0 %v901_v15, %s4226_s25 }
 0xe45   : > { %v4136_v18 = vpop.eup %4135  ;;  %904 = vrot.lane.b32.xlu1 %v900_v16, %s4226_s25 }
 0xe46   : > { %v4138_v21 = vpop.eup %4137  ;;  %v2154_v38 = vpop.xlane.xlu1 %2153  ;;  %v1446_v26 = vmul.f32 %v4136_v18, %v4555_v54 }
 0xe47   : > { %4147 = vrcp.f32 %v2154_v38  ;;  %v1611_v28 = vpop.xlane.xlu0 %1610  ;;  %v1173_v30 = vmul.f32 %v4138_v21, %v4513_v48 }
 0xe48   : > { %4149 = vrcp.f32 %v1611_v28  ;;  %1450 = vrot.lane.b32.xlu0 %v1446_v26, %s4227_s26 }
 0xe49   : > { %v4140_v50 = vpop.eup %4139  ;;  %1177 = vrot.lane.b32.xlu1 %v1173_v30, %s4228_s27 }
 0xe4a   : > { %v4142_v51 = vpop.eup %4141  ;;  %v1719_v31 = vmul.f32 %v4140_v50, %v4597_v55 }
 0xe4b   : > { %v1884_v36 = vpop.xlane.xlu0 %1883  ;;  %v1174_v37 = vmul.f32 %v4142_v51, %v4511_v47 }
 0xe4c   : > { %4151 = vrcp.f32 %v1884_v36  ;;  %1723 = vrot.lane.b32.xlu0 %v1719_v31, %s4229_s28 }
 0xe4d   : > { %v4144_v54 = vpop.eup %4143  ;;  %1179 = vrot.lane.b32.xlu1 %v1174_v37, %s4228_s27 }
 0xe4e   : > { %v4146_v40 = vpop.eup %4145  ;;  %v1992_v48 = vmul.f32 %v4144_v54, %v4653_v20 }
 0xe4f   : > { %v2157_v4 = vpop.xlane.xlu0 %2156  ;;  %v1447_v17 = vmul.f32 %v4146_v40, %v4553_v53 }
 0xe50   : > { %4153 = vrcp.f32 %v2157_v4  ;;  %1996 = vrot.lane.b32.xlu0 %v1992_v48, %s4230_s29 }
 0xe51   : > { %v4148_v14 = vpop.eup %4147  ;;  %1452 = vrot.lane.b32.xlu1 %v1447_v17, %s4227_s26 }
 0xe52   : > { %v4150_v55 = vpop.eup %4149  ;;  %v2265_v8 = vmul.f32 %v4148_v14, %v4692_v24 }
 0xe53   : > { %v1720_v47 = vmul.f32 %v4150_v55, %v4595_v49 }
 0xe54   : > { %2269 = vrot.lane.b32.xlu0 %v2265_v8, %s4231_s30 }
 0xe55   : > { %1725 = vrot.lane.b32.xlu1 %v1720_v47, %s4229_s28 }
 0xe56   : > { %v4152_v32 = vpop.eup %4151 }
 0xe57   : > { %v1993_v9 = vmul.f32 %v4152_v32, %v4651_v19 }
 0xe59   : > { %1998 = vrot.lane.b32.xlu1 %v1993_v9, %s4230_s29 }
 0xe5a   : > { %v4154_v20 = vpop.eup %4153 }
 0xe5b   : > { %v2266_v53 = vmul.f32 %v4154_v20, %v4690_v22 }
 0xe5d   : > { %2271 = vrot.lane.b32.xlu1 %v2266_v53, %s4231_s30 }
 0xe9f   : > { %v2430_v33 = vpop.xlane.xlu0 %2429 }
 0xea0   : > { %v2427_v12 = vpop.xlane.xlu1 %2426 }
 0xea3   : > { %v528_v35 = vpop.xlane.xlu0 %527 }
 0xea4   : > { %4155 = vrcp.f32 %v528_v35  ;;  %v525_v41 = vpop.xlane.xlu1 %524 }
 0xea5   : > { %4157 = vrcp.f32 %v525_v41 }
 0xea6   : > { %4159 = vrcp.f32 %v2430_v33 }
 0xea7   : > { %4161 = vrcp.f32 %v2427_v12 }
 0xeae   : > { %v4156_v24 = vpop.eup %4155 }
 0xeaf   : > { %v4158_v29 = vpop.eup %4157  ;;  %v637_v49 = vmul.f32 %v4156_v24, %v4427_v58 }
 0xeb0   : > { %v636_v13 = vmul.f32 %v4158_v29, %v4429_v59  ;;  %v4160_v62 = vpop.eup %4159 }
 0xeb1   : > { %639 = vst.msk [vmem:[#allocation3 + $0x8] sm:$0xff] %vm412_vm2, %v637_v49  ;;  %v4162_v1 = vpop.eup %4161 }
 0xeb2   : > { %638 = vst.msk [vmem:[#allocation3] sm:$0xff] %vm412_vm2, %v636_v13 }
 0xeb6   : > { %v907_v19 = vpop.permute.xlu0 %906 }
 0xeb7   : > { %912 = vst.msk [vmem:[#allocation3 + $0x8] sm:$0xff] %vm910_vm5, %v907_v19  ;;  %v905_v22 = vpop.permute.xlu1 %904 }
 0xeb8   : > { %911 = vst.msk [vmem:[#allocation3] sm:$0xff] %vm910_vm5, %v905_v22 }
 0xeba   : > { %v1451_v42 = vpop.permute.xlu0 %1450 }
 0xebb   : > { %v1178_v43 = vpop.permute.xlu1 %1177 }
 0xebc   : > { %1184 = vst.msk [vmem:[#allocation3] sm:$0xff] %vm1183_vm6, %v1178_v43 }
 0xebd   : > { %1457 = vst.msk [vmem:[#allocation3] sm:$0xff] %vm1456_vm7, %v1451_v42 }
 0xebe   : > { %v1724_v6 = vpop.permute.xlu0 %1723 }
 0xebf   : > { %1730 = vst.msk [vmem:[#allocation3] sm:$0xff] %vm1729_vm8, %v1724_v6  ;;  %v1180_v58 = vpop.permute.xlu1 %1179 }
 0xec0   : > { %1185 = vst.msk [vmem:[#allocation3 + $0x8] sm:$0xff] %vm1183_vm6, %v1180_v58 }
 0xec2   : > { %v1997_v59 = vpop.permute.xlu0 %1996 }
 0xec3   : > { %2003 = vst.msk [vmem:[#allocation3] sm:$0xff] %vm2002_vm9, %v1997_v59  ;;  %v1453_v34 = vpop.permute.xlu1 %1452 }
 0xec4   : > { %1458 = vst.msk [vmem:[#allocation3 + $0x8] sm:$0xff] %vm1456_vm7, %v1453_v34 }
 0xec6   : > { %v2270_v44 = vpop.permute.xlu0 %2269 }
 0xec7   : > { %2276 = vst.msk [vmem:[#allocation3] sm:$0xff] %vm2275_vm10, %v2270_v44  ;;  %v1726_v10 = vpop.permute.xlu1 %1725 }
 0xec8   : > { %1731 = vst.msk [vmem:[#allocation3 + $0x8] sm:$0xff] %vm1729_vm8, %v1726_v10 }
 0xecb   : > { %v1999_v45 = vpop.permute.xlu1 %1998 }
 0xecc   : > { %2004 = vst.msk [vmem:[#allocation3 + $0x8] sm:$0xff] %vm2002_vm9, %v1999_v45 }
 0xecf   : > { %v2272_v0 = vpop.permute.xlu1 %2271 }
 0xed0   : > { %2277 = vst.msk [vmem:[#allocation3 + $0x8] sm:$0xff] %vm2275_vm10, %v2272_v0 }
 0xee6   : > { %v3357_v63 = vpop.f32.mrb[14].mxu0 }
 0xee7   : > { %v2539_v2 = vmul.f32 %v4160_v62, %v3357_v63  ;;  %v2527_v52 = vpop.f32.mrb[15].mxu0 }
 0xee8   : > { %v2538_v3 = vmul.f32 %v4162_v1, %v2527_v52 }
 0xee9   : > { %2544 = vrot.lane.b32.xlu1 %v2539_v2, %s4232_s14 }
 0xeea   : > { %2542 = vrot.lane.b32.xlu0 %v2538_v3, %s4232_s14 }
 0xf5b   : > { %v2545_v5 = vpop.permute.xlu1 %2544 }
 0xf5c   : > { %2550 = vst.msk [vmem:[#allocation3 + $0x8] sm:$0xff] %vm2548_vm11, %v2545_v5  ;;  %v2543_v25 = vpop.permute.xlu0 %2542 }
 0xf5d   : > { %2549 = vst.msk [vmem:[#allocation3] sm:$0xff] %vm2548_vm11, %v2543_v25 }
 0xf63   : > { %v2552_v11 = vld [vmem:[#allocation3 + $0x8] sm:$0xff] }
 0xf64   : > { %v2551_v7 = vld [vmem:[#allocation3] sm:$0xff] }
 0xf65   : > { %3366 = vmatprep.mubr.msk.f32.mxu0 %vm2564_vm12, %v2551_v7 }
 0xf66   : > { %3367 = vmatmul.mubr.msk.f32.vlgmr.msra.gmra.mrb[16].mxu0 %vm2564_vm12, %v2552_v11 }
0x1039   : > { %v3368_v15 = vpop.f32.mrb[16].mxu0 }
0x103a   : > { %v2643_v23 = vadd.f32 %v3368_v15, %v2850_v27  ;;  %v2637_v16 = vpop.f32.mrb[17].mxu0 }
0x103b   : > { %v2638_v18 = vadd.f32 %v2850_v27, %v2637_v16 }
0x103c   : > { %2647 = vst.msk [vmem:[%s4299_s6 + $0x8] sm:$0xff] %vm2564_vm12, %v2643_v23 }
0x103d   : > { %2646 = vst.msk [vmem:[%s4299_s6] sm:$0xff] %vm2564_vm12, %v2638_v18 }
0x103e PF: > { %s14_s19 = sadd.s32 1, %s4201_s19   ;;  %s4786_s15 = smov %s4193_s17 }
0x103f   : > { %p11_p8 = scmp.ge.s32.totalorder %s14_s19, 10   ;;  %s4787_s16 = smov %s4197_s18 }
0x1040   : > { %s4788_s17 = smov %s4791_s20  ;;  %s4789_s18 = smov %s4795_s21 }
0x1041   :  { %13 = sbr.rel (!%p11_p8) target bundleno = 3 (0x3), region = 71 }

</bundles_post_ra>
